<compile_context>
chip_gen: v7x
topology: tpu7x:2x2x1
jax: 0.10.0
libtpu: 0.0.40
codegen_flags: <defaults>
</compile_context>

<pallas_src>
import functools

import jax
import jax.numpy as jnp
from jax import lax
from jax.experimental import pallas as pl
from jax.experimental.pallas import tpu as pltpu


def transformer_layer_kernel(
    x_ref,
    wq_ref, bq_ref, wkv_ref, bkv_ref,
    g1_ref, be1_ref,
    w1_ref, b1_ref, w2_ref, b2_ref,
    g2_ref, be2_ref,
    out_ref,
    k_scr, v_scr, ctx_scr,
    *, n_heads, d_k, tq):
    f32, bf16 = jnp.float32, jnp.bfloat16
    d_model = n_heads * d_k
    qi = pl.program_id(1)

    # --- K/V projection: once per batch element (query-tile 0), cached in bf16 scratch.
    #     Safe because the query-tile grid axis is "arbitrary" (sequential per core). ---
    @pl.when(qi == 0)
    def _():
        xkv = x_ref[0].astype(bf16)                                        # (S, D)
        kv = jnp.dot(xkv, wkv_ref[...], preferred_element_type=f32) + bkv_ref[...]
        k_scr[...] = kv[:, :d_model].astype(bf16)
        v_scr[...] = kv[:, d_model:].astype(bf16)

    # --- query / residual rows for this tile, sliced from the resident sequence block ---
    row0 = pl.multiple_of(qi * tq, tq)
    xq = x_ref[0, pl.ds(row0, tq), :]                                      # (TQ, D) f32

    # Hoist (1, X) parameter reads once (JAX does not CSE broadcast_in_dim).
    bq = bq_ref[...]
    g1, be1 = g1_ref[...], be1_ref[...]
    b1, b2 = b1_ref[...], b2_ref[...]
    g2, be2 = g2_ref[...], be2_ref[...]

    # Q projection for this tile; cast to bf16 once (not per head).
    q = (jnp.dot(xq.astype(bf16), wq_ref[...],
                 preferred_element_type=f32) + bq).astype(bf16)            # (TQ, D)
    k = k_scr[...]                                                         # (S, D) bf16
    v = v_scr[...]                                                         # (S, D) bf16

    # --- per-head scaled dot-product attention (mask=None, dropout=0) ---
    # Reference subtracts the *global* max before softmax; softmax is shift-invariant, so the
    # per-row stable softmax below is numerically equivalent.
    # TODO(synk): optional attention `mask` (masked_fill + NaN zeroing) and dropout are not
    # implemented; this kernel covers the mask=None, dropout=0 forward path.
    # TODO(synk): for very long S / large d_ff (esp. v7x 64 MiB VMEM), switch to flash-style
    # KV tiling + d_ff tiling and a fori_loop over heads so live VMEM scales with TQ*chunk.
    scale = 1.0 / (d_k ** 0.5)
    for h in range(n_heads):
        lo = h * d_k
        qh = q[:, lo:lo + d_k]
        kh = k[:, lo:lo + d_k]
        vh = v[:, lo:lo + d_k]
        # Contract the last dims directly (Q @ K^T) without materializing a transposed K.
        s = lax.dot_general(qh, kh, (((1,), (1,)), ((), ())),
                            preferred_element_type=f32) * scale            # (TQ, S)
        s = s - jnp.max(s, axis=-1, keepdims=True)
        p = jnp.exp(s)
        p = p * pl.reciprocal(jnp.sum(p, axis=-1, keepdims=True), approx=True)
        # Write this head's PV result straight into the context slab (no concat relayout).
        ctx_scr[:, lo:lo + d_k] = jnp.dot(p.astype(bf16), vh,
                                          preferred_element_type=f32)
    context = ctx_scr[...]                                                  # (TQ, D) f32

    def layer_norm(y, g, b, eps=1e-5):
        mu = jnp.mean(y, axis=-1, keepdims=True)
        var = jnp.mean((y - mu) ** 2, axis=-1, keepdims=True)
        return (y - mu) * lax.rsqrt(var + eps) * g + b

    # --- residual + LN1, position-wise FFN (bf16 hidden), residual + LN2 ---
    h1 = layer_norm(context + xq, g1, be1)
    ff = jnp.maximum(jnp.dot(h1.astype(bf16), w1_ref[...],
                             preferred_element_type=f32) + b1, 0.0).astype(bf16)
    ff = jnp.dot(ff, w2_ref[...], preferred_element_type=f32) + b2
    out_ref[0] = layer_norm(ff + h1, g2, be2).astype(out_ref.dtype)


def _pick_query_tile(S):
    if S <= 256:
        return S
    for t in (256, 128, 64):
        if S % t == 0:
            return t
    return S


def _vmem_limit_bytes():
    # Use most of physical VMEM (128 MiB on v5e/v6e, 64 MiB/TC on v7x), leave compiler headroom.
    try:
        cap = int(pltpu.get_tpu_info().vmem_capacity_bytes)
    except Exception:
        cap = 128 * 2**20
    return max(32 * 2**20, int(cap * 0.78))


def transformer_layer(seq, params, n_heads):
    B, S, D = seq.shape
    d_k = D // n_heads
    bf16 = jnp.bfloat16

    # Host-side, once per call: PyTorch nn.Linear stores W as (out, in); pre-transpose to
    # (in, out), fuse K|V into one (D, 2D) slab, and cast matmul weights to bf16 so every
    # in-kernel matmul is a plain `x @ W` on the MXU.
    wq = params['wq'].T.astype(bf16)
    wkv = jnp.concatenate([params['wk'].T, params['wv'].T], axis=1).astype(bf16)
    bkv = jnp.concatenate([params['bk'], params['bv']], axis=1)
    w1 = params['w1'].T.astype(bf16)
    w2 = params['w2'].T.astype(bf16)
    param_list = [wq, params['bq'], wkv, bkv,
                  params['g1'], params['be1'],
                  w1, params['b1'], w2, params['b2'],
                  params['g2'], params['be2']]

    TQ = _pick_query_tile(S)
    n_q_blocks = S // TQ

    kernel = functools.partial(transformer_layer_kernel,
                               n_heads=n_heads, d_k=d_k, tq=TQ)
    in_specs = [
        # Full sequence block: constant block index per batch element, so it stays
        # VMEM-resident across all query tiles of that element (K/V source + query rows).
        pl.BlockSpec((1, S, D), lambda b, i: (b, 0, 0)),
    ] + [
        # Weights / biases: constant index maps -> VMEM-resident across the whole grid.
        pl.BlockSpec(p.shape, lambda b, i: (0, 0)) for p in param_list
    ]

    return pl.pallas_call(
        kernel,
        out_shape=jax.ShapeDtypeStruct((B, S, D), seq.dtype),
        grid=(B, n_q_blocks),
        in_specs=in_specs,
        out_specs=pl.BlockSpec((1, TQ, D), lambda b, i: (b, i, 0)),
        scratch_shapes=[pltpu.VMEM((S, D), bf16),            # cached K (per batch element)
                        pltpu.VMEM((S, D), bf16),            # cached V (per batch element)
                        pltpu.VMEM((TQ, D), jnp.float32)],   # per-tile context slab
        compiler_params=pltpu.CompilerParams(
            dimension_semantics=("parallel", "arbitrary"),
            vmem_limit_bytes=_vmem_limit_bytes()),
    )(seq, *param_list)


def reference(seq, params, n_heads):
    """Pure-JAX (f32) replica of the PyTorch forward (mask=None, dropout=0)."""
    B, S, D = seq.shape
    d_k = D // n_heads

    def lin(x, w, b):
        return x @ w.T + b.reshape(-1)

    def split(x):
        return x.reshape(B, S, n_heads, d_k).transpose(0, 2, 1, 3)

    q = split(lin(seq, params['wq'], params['bq']))
    k = split(lin(seq, params['wk'], params['bk']))
    v = split(lin(seq, params['wv'], params['bv']))
    scores = jnp.einsum('bhqd,bhkd->bhqk', q, k) / jnp.sqrt(jnp.float32(d_k))
    scores = jax.nn.softmax(scores - scores.max(), axis=-1)
    ctx = jnp.einsum('bhqk,bhkd->bhqd', scores, v).transpose(0, 2, 1, 3).reshape(B, S, D)

    def ln(x, g, b, eps=1e-5):
        mu = x.mean(-1, keepdims=True)
        var = ((x - mu) ** 2).mean(-1, keepdims=True)
        return (x - mu) / jnp.sqrt(var + eps) * g.reshape(-1) + b.reshape(-1)

    h1 = ln(ctx + seq, params['g1'], params['be1'])
    ff = jax.nn.relu(lin(h1, params['w1'], params['b1']))
    ff = lin(ff, params['w2'], params['b2'])
    return ln(ff + h1, params['g2'], params['be2'])


def init_params(key, d_model, d_ff):
    ks = jax.random.split(key, 10)
    f32 = jnp.float32

    def w(k, shape, scale=0.1):
        return (scale * jax.random.normal(k, shape)).astype(f32)

    return {
        'wq': w(ks[0], (d_model, d_model)), 'bq': w(ks[1], (1, d_model)),
        'wk': w(ks[2], (d_model, d_model)), 'bk': w(ks[3], (1, d_model)),
        'wv': w(ks[4], (d_model, d_model)), 'bv': w(ks[5], (1, d_model)),
        'g1': jnp.ones((1, d_model), f32), 'be1': jnp.zeros((1, d_model), f32),
        'w1': w(ks[6], (d_ff, d_model)), 'b1': w(ks[7], (1, d_ff)),
        'w2': w(ks[8], (d_model, d_ff)), 'b2': w(ks[9], (1, d_model)),
        'g2': jnp.ones((1, d_model), f32), 'be2': jnp.zeros((1, d_model), f32),
    }


if __name__ == "__main__":
    B, S, d_model, d_ff, n_heads = 2, 8, 32, 64, 4

    key = jax.random.PRNGKey(0)
    k_seq, k_par = jax.random.split(key)
    seq = jax.random.normal(k_seq, (B, S, d_model), dtype=jnp.float32)
    params = init_params(k_par, d_model, d_ff)

    out = transformer_layer(seq, params, n_heads)
    out = jax.block_until_ready(out)

    ref = reference(seq, params, n_heads)
    assert out.shape == (B, S, d_model)
    assert bool(jnp.all(jnp.isfinite(out)))
    assert bool(jnp.allclose(out, ref, atol=5e-2, rtol=5e-2)), "mismatch vs JAX reference"

    print("KERNEL_OK")
</pallas_src>

<mosaic_0001>
module attributes {stable_mosaic.version = 11 : i64} {
  func.func @transformer_layer_kernel(%arg0: i32, %arg1: i32, %arg2: memref<1x8x32xf32, #tpu.memory_space<vmem>>, %arg3: memref<32x32xbf16, #tpu.memory_space<vmem>>, %arg4: memref<1x32xf32, #tpu.memory_space<vmem>>, %arg5: memref<32x64xbf16, #tpu.memory_space<vmem>>, %arg6: memref<1x64xf32, #tpu.memory_space<vmem>>, %arg7: memref<1x32xf32, #tpu.memory_space<vmem>>, %arg8: memref<1x32xf32, #tpu.memory_space<vmem>>, %arg9: memref<32x64xbf16, #tpu.memory_space<vmem>>, %arg10: memref<1x64xf32, #tpu.memory_space<vmem>>, %arg11: memref<64x32xbf16, #tpu.memory_space<vmem>>, %arg12: memref<1x32xf32, #tpu.memory_space<vmem>>, %arg13: memref<1x32xf32, #tpu.memory_space<vmem>>, %arg14: memref<1x32xf32, #tpu.memory_space<vmem>>, %arg15: memref<1x8x32xf32, #tpu.memory_space<vmem>>, %arg16: memref<8x32xbf16, #tpu.memory_space<vmem>>, %arg17: memref<8x32xbf16, #tpu.memory_space<vmem>>, %arg18: memref<8x32xf32, #tpu.memory_space<vmem>>) attributes {dimension_semantics = [#tpu.dimension_semantics<parallel>, #tpu.dimension_semantics<arbitrary>], iteration_bounds = array<i64: 2, 1>, scalar_prefetch = 0 : i64, scratch_operands = 3 : i64, tpu.core_type = #tpu.core_type<tc>, window_params = [{transform_indices = @transform_0, window_bounds = array<i64: 1, 8, 32>}, {pipeline_mode = #tpu.pipeline_mode<synchronous>, transform_indices = @transform_1, window_bounds = array<i64: 32, 32>}, {pipeline_mode = #tpu.pipeline_mode<synchronous>, transform_indices = @transform_2, window_bounds = array<i64: 1, 32>}, {pipeline_mode = #tpu.pipeline_mode<synchronous>, transform_indices = @transform_3, window_bounds = array<i64: 32, 64>}, {pipeline_mode = #tpu.pipeline_mode<synchronous>, transform_indices = @transform_4, window_bounds = array<i64: 1, 64>}, {pipeline_mode = #tpu.pipeline_mode<synchronous>, transform_indices = @transform_5, window_bounds = array<i64: 1, 32>}, {pipeline_mode = #tpu.pipeline_mode<synchronous>, transform_indices = @transform_6, window_bounds = array<i64: 1, 32>}, {pipeline_mode = #tpu.pipeline_mode<synchronous>, transform_indices = @transform_7, window_bounds = array<i64: 32, 64>}, {pipeline_mode = #tpu.pipeline_mode<synchronous>, transform_indices = @transform_8, window_bounds = array<i64: 1, 64>}, {pipeline_mode = #tpu.pipeline_mode<synchronous>, transform_indices = @transform_9, window_bounds = array<i64: 64, 32>}, {pipeline_mode = #tpu.pipeline_mode<synchronous>, transform_indices = @transform_10, window_bounds = array<i64: 1, 32>}, {pipeline_mode = #tpu.pipeline_mode<synchronous>, transform_indices = @transform_11, window_bounds = array<i64: 1, 32>}, {pipeline_mode = #tpu.pipeline_mode<synchronous>, transform_indices = @transform_12, window_bounds = array<i64: 1, 32>}, {transform_indices = @transform_13, window_bounds = array<i64: 1, 8, 32>}]} {
    %c0_i32 = arith.constant 0 : i32
    %0 = arith.cmpi eq, %arg1, %c0_i32 : i32
    %1 = arith.extui %0 : i1 to i32
    %c0_i32_0 = arith.constant 0 : i32
    %2 = arith.cmpi ne, %1, %c0_i32_0 : i32
    scf.if %2 {
      %c0_69 = arith.constant 0 : index
      %c0_70 = arith.constant 0 : index
      %c0_71 = arith.constant 0 : index
      %161 = vector.load %arg2[%c0_69, %c0_70, %c0_71] : memref<1x8x32xf32, #tpu.memory_space<vmem>>, vector<1x8x32xf32>
      %162 = vector.shape_cast %161 : vector<1x8x32xf32> to vector<8x32xf32>
      %163 = arith.truncf %162 : vector<8x32xf32> to vector<8x32xbf16>
      %c0_72 = arith.constant 0 : index
      %c0_73 = arith.constant 0 : index
      %164 = vector.load %arg5[%c0_72, %c0_73] : memref<32x64xbf16, #tpu.memory_space<vmem>>, vector<32x64xbf16>
      %cst_74 = arith.constant dense<0.000000e+00> : vector<8x64xf32>
      %165 = tpu.matmul %163, %164, %cst_74 {dimension_numbers = #tpu.dot_dimension_numbers<[1], [0], [0], [1], [0, 0, 1, 1], [], []>} : vector<8x32xbf16>, vector<32x64xbf16>, vector<8x64xf32> -> vector<8x64xf32>
      %c0_75 = arith.constant 0 : index
      %c0_76 = arith.constant 0 : index
      %166 = vector.load %arg6[%c0_75, %c0_76] : memref<1x64xf32, #tpu.memory_space<vmem>>, vector<1x64xf32>
      %167 = vector.broadcast %166 : vector<1x64xf32> to vector<8x64xf32>
      %168 = arith.addf %165, %167 : vector<8x64xf32>
      %169 = vector.extract_strided_slice %168 {offsets = [0, 0], sizes = [8, 32], strides = [1, 1]} : vector<8x64xf32> to vector<8x32xf32>
      %170 = arith.truncf %169 : vector<8x32xf32> to vector<8x32xbf16>
      %c0_77 = arith.constant 0 : index
      %c0_78 = arith.constant 0 : index
      %171 = vector.load %arg16[%c0_77, %c0_78] : memref<8x32xbf16, #tpu.memory_space<vmem>>, vector<8x32xbf16>
      tpu.vector_store %arg16[%c0_77, %c0_78], %170 {strides = array<i32>} : memref<8x32xbf16, #tpu.memory_space<vmem>>, vector<8x32xbf16>,
      %172 = vector.extract_strided_slice %168 {offsets = [0, 32], sizes = [8, 32], strides = [1, 1]} : vector<8x64xf32> to vector<8x32xf32>
      %173 = arith.truncf %172 : vector<8x32xf32> to vector<8x32xbf16>
      %c0_79 = arith.constant 0 : index
      %c0_80 = arith.constant 0 : index
      %174 = vector.load %arg17[%c0_79, %c0_80] : memref<8x32xbf16, #tpu.memory_space<vmem>>, vector<8x32xbf16>
      tpu.vector_store %arg17[%c0_79, %c0_80], %173 {strides = array<i32>} : memref<8x32xbf16, #tpu.memory_space<vmem>>, vector<8x32xbf16>,
    } else {
    }
    %c8_i32 = arith.constant 8 : i32
    %3 = arith.muli %arg1, %c8_i32 : i32
    %4 = tpu.assume_multiple %3, 8 : i32
    %c0 = arith.constant 0 : index
    %5 = arith.index_cast %4 : i32 to index
    %c0_1 = arith.constant 0 : index
    %6 = vector.load %arg2[%c0, %5, %c0_1] : memref<1x8x32xf32, #tpu.memory_space<vmem>>, vector<1x8x32xf32>
    %7 = vector.shape_cast %6 : vector<1x8x32xf32> to vector<8x32xf32>
    %c0_2 = arith.constant 0 : index
    %c0_3 = arith.constant 0 : index
    %8 = vector.load %arg4[%c0_2, %c0_3] : memref<1x32xf32, #tpu.memory_space<vmem>>, vector<1x32xf32>
    %c0_4 = arith.constant 0 : index
    %c0_5 = arith.constant 0 : index
    %9 = vector.load %arg7[%c0_4, %c0_5] : memref<1x32xf32, #tpu.memory_space<vmem>>, vector<1x32xf32>
    %c0_6 = arith.constant 0 : index
    %c0_7 = arith.constant 0 : index
    %10 = vector.load %arg8[%c0_6, %c0_7] : memref<1x32xf32, #tpu.memory_space<vmem>>, vector<1x32xf32>
    %c0_8 = arith.constant 0 : index
    %c0_9 = arith.constant 0 : index
    %11 = vector.load %arg10[%c0_8, %c0_9] : memref<1x64xf32, #tpu.memory_space<vmem>>, vector<1x64xf32>
    %c0_10 = arith.constant 0 : index
    %c0_11 = arith.constant 0 : index
    %12 = vector.load %arg12[%c0_10, %c0_11] : memref<1x32xf32, #tpu.memory_space<vmem>>, vector<1x32xf32>
    %c0_12 = arith.constant 0 : index
    %c0_13 = arith.constant 0 : index
    %13 = vector.load %arg13[%c0_12, %c0_13] : memref<1x32xf32, #tpu.memory_space<vmem>>, vector<1x32xf32>
    %c0_14 = arith.constant 0 : index
    %c0_15 = arith.constant 0 : index
    %14 = vector.load %arg14[%c0_14, %c0_15] : memref<1x32xf32, #tpu.memory_space<vmem>>, vector<1x32xf32>
    %15 = arith.truncf %7 : vector<8x32xf32> to vector<8x32xbf16>
    %c0_16 = arith.constant 0 : index
    %c0_17 = arith.constant 0 : index
    %16 = vector.load %arg3[%c0_16, %c0_17] : memref<32x32xbf16, #tpu.memory_space<vmem>>, vector<32x32xbf16>
    %cst = arith.constant dense<0.000000e+00> : vector<8x32xf32>
    %17 = tpu.matmul %15, %16, %cst {dimension_numbers = #tpu.dot_dimension_numbers<[1], [0], [0], [1], [0, 0, 1, 1], [], []>} : vector<8x32xbf16>, vector<32x32xbf16>, vector<8x32xf32> -> vector<8x32xf32>
    %18 = vector.broadcast %8 : vector<1x32xf32> to vector<8x32xf32>
    %19 = arith.addf %17, %18 : vector<8x32xf32>
    %20 = arith.truncf %19 : vector<8x32xf32> to vector<8x32xbf16>
    %c0_18 = arith.constant 0 : index
    %c0_19 = arith.constant 0 : index
    %21 = vector.load %arg16[%c0_18, %c0_19] : memref<8x32xbf16, #tpu.memory_space<vmem>>, vector<8x32xbf16>
    %c0_20 = arith.constant 0 : index
    %c0_21 = arith.constant 0 : index
    %22 = vector.load %arg17[%c0_20, %c0_21] : memref<8x32xbf16, #tpu.memory_space<vmem>>, vector<8x32xbf16>
    %23 = vector.extract_strided_slice %20 {offsets = [0, 0], sizes = [8, 8], strides = [1, 1]} : vector<8x32xbf16> to vector<8x8xbf16>
    %24 = vector.extract_strided_slice %21 {offsets = [0, 0], sizes = [8, 8], strides = [1, 1]} : vector<8x32xbf16> to vector<8x8xbf16>
    %25 = vector.extract_strided_slice %22 {offsets = [0, 0], sizes = [8, 8], strides = [1, 1]} : vector<8x32xbf16> to vector<8x8xbf16>
    %cst_22 = arith.constant dense<0.000000e+00> : vector<8x8xf32>
    %26 = tpu.matmul %23, %24, %cst_22 {dimension_numbers = #tpu.dot_dimension_numbers<[1], [1], [0], [0], [0, 0, 1, 0], [], []>} : vector<8x8xbf16>, vector<8x8xbf16>, vector<8x8xf32> -> vector<8x8xf32>
    %cst_23 = arith.constant 0.353553385 : f32
    %27 = vector.broadcast %cst_23 : f32 to vector<8x8xf32>
    %28 = arith.mulf %26, %27 : vector<8x8xf32>
    %cst_24 = arith.constant dense<0xFF800000> : vector<8xf32>
    %29 = vector.multi_reduction <maximumf>, %28, %cst_24 [1] : vector<8x8xf32> to vector<8xf32>
    %30 = vector.shape_cast %29 : vector<8xf32> to vector<8x1xf32>
    %31 = vector.broadcast %30 : vector<8x1xf32> to vector<8x8xf32>
    %32 = arith.subf %28, %31 : vector<8x8xf32>
    %33 = math.exp %32 : vector<8x8xf32>
    %cst_25 = arith.constant dense<0.000000e+00> : vector<8xf32>
    %34 = vector.multi_reduction <add>, %33, %cst_25 [1] : vector<8x8xf32> to vector<8xf32>
    %35 = vector.shape_cast %34 : vector<8xf32> to vector<8x1xf32>
    %36 = tpu.reciprocal %35 {approx = true} : vector<8x1xf32> -> vector<8x1xf32>
    %37 = vector.broadcast %36 : vector<8x1xf32> to vector<8x8xf32>
    %38 = arith.mulf %33, %37 : vector<8x8xf32>
    %39 = arith.truncf %38 : vector<8x8xf32> to vector<8x8xbf16>
    %cst_26 = arith.constant dense<0.000000e+00> : vector<8x8xf32>
    %40 = tpu.matmul %39, %25, %cst_26 {dimension_numbers = #tpu.dot_dimension_numbers<[1], [0], [0], [1], [0, 0, 1, 1], [], []>} : vector<8x8xbf16>, vector<8x8xbf16>, vector<8x8xf32> -> vector<8x8xf32>
    %c0_27 = arith.constant 0 : index
    %c0_28 = arith.constant 0 : index
    %41 = vector.load %arg18[%c0_27, %c0_28] : memref<8x32xf32, #tpu.memory_space<vmem>>, vector<8x8xf32>
    tpu.vector_store %arg18[%c0_27, %c0_28], %40 {strides = array<i32>} : memref<8x32xf32, #tpu.memory_space<vmem>>, vector<8x8xf32>,
    %42 = vector.extract_strided_slice %20 {offsets = [0, 8], sizes = [8, 8], strides = [1, 1]} : vector<8x32xbf16> to vector<8x8xbf16>
    %43 = vector.extract_strided_slice %21 {offsets = [0, 8], sizes = [8, 8], strides = [1, 1]} : vector<8x32xbf16> to vector<8x8xbf16>
    %44 = vector.extract_strided_slice %22 {offsets = [0, 8], sizes = [8, 8], strides = [1, 1]} : vector<8x32xbf16> to vector<8x8xbf16>
    %cst_29 = arith.constant dense<0.000000e+00> : vector<8x8xf32>
    %45 = tpu.matmul %42, %43, %cst_29 {dimension_numbers = #tpu.dot_dimension_numbers<[1], [1], [0], [0], [0, 0, 1, 0], [], []>} : vector<8x8xbf16>, vector<8x8xbf16>, vector<8x8xf32> -> vector<8x8xf32>
    %cst_30 = arith.constant 0.353553385 : f32
    %46 = vector.broadcast %cst_30 : f32 to vector<8x8xf32>
    %47 = arith.mulf %45, %46 : vector<8x8xf32>
    %cst_31 = arith.constant dense<0xFF800000> : vector<8xf32>
    %48 = vector.multi_reduction <maximumf>, %47, %cst_31 [1] : vector<8x8xf32> to vector<8xf32>
    %49 = vector.shape_cast %48 : vector<8xf32> to vector<8x1xf32>
    %50 = vector.broadcast %49 : vector<8x1xf32> to vector<8x8xf32>
    %51 = arith.subf %47, %50 : vector<8x8xf32>
    %52 = math.exp %51 : vector<8x8xf32>
    %cst_32 = arith.constant dense<0.000000e+00> : vector<8xf32>
    %53 = vector.multi_reduction <add>, %52, %cst_32 [1] : vector<8x8xf32> to vector<8xf32>
    %54 = vector.shape_cast %53 : vector<8xf32> to vector<8x1xf32>
    %55 = tpu.reciprocal %54 {approx = true} : vector<8x1xf32> -> vector<8x1xf32>
    %56 = vector.broadcast %55 : vector<8x1xf32> to vector<8x8xf32>
    %57 = arith.mulf %52, %56 : vector<8x8xf32>
    %58 = arith.truncf %57 : vector<8x8xf32> to vector<8x8xbf16>
    %cst_33 = arith.constant dense<0.000000e+00> : vector<8x8xf32>
    %59 = tpu.matmul %58, %44, %cst_33 {dimension_numbers = #tpu.dot_dimension_numbers<[1], [0], [0], [1], [0, 0, 1, 1], [], []>} : vector<8x8xbf16>, vector<8x8xbf16>, vector<8x8xf32> -> vector<8x8xf32>
    %c0_34 = arith.constant 0 : index
    %c8 = arith.constant 8 : index
    %60 = vector.load %arg18[%c0_34, %c8] : memref<8x32xf32, #tpu.memory_space<vmem>>, vector<8x8xf32>
    tpu.vector_store %arg18[%c0_34, %c8], %59 {strides = array<i32>} : memref<8x32xf32, #tpu.memory_space<vmem>>, vector<8x8xf32>,
    %61 = vector.extract_strided_slice %20 {offsets = [0, 16], sizes = [8, 8], strides = [1, 1]} : vector<8x32xbf16> to vector<8x8xbf16>
    %62 = vector.extract_strided_slice %21 {offsets = [0, 16], sizes = [8, 8], strides = [1, 1]} : vector<8x32xbf16> to vector<8x8xbf16>
    %63 = vector.extract_strided_slice %22 {offsets = [0, 16], sizes = [8, 8], strides = [1, 1]} : vector<8x32xbf16> to vector<8x8xbf16>
    %cst_35 = arith.constant dense<0.000000e+00> : vector<8x8xf32>
    %64 = tpu.matmul %61, %62, %cst_35 {dimension_numbers = #tpu.dot_dimension_numbers<[1], [1], [0], [0], [0, 0, 1, 0], [], []>} : vector<8x8xbf16>, vector<8x8xbf16>, vector<8x8xf32> -> vector<8x8xf32>
    %cst_36 = arith.constant 0.353553385 : f32
    %65 = vector.broadcast %cst_36 : f32 to vector<8x8xf32>
    %66 = arith.mulf %64, %65 : vector<8x8xf32>
    %cst_37 = arith.constant dense<0xFF800000> : vector<8xf32>
    %67 = vector.multi_reduction <maximumf>, %66, %cst_37 [1] : vector<8x8xf32> to vector<8xf32>
    %68 = vector.shape_cast %67 : vector<8xf32> to vector<8x1xf32>
    %69 = vector.broadcast %68 : vector<8x1xf32> to vector<8x8xf32>
    %70 = arith.subf %66, %69 : vector<8x8xf32>
    %71 = math.exp %70 : vector<8x8xf32>
    %cst_38 = arith.constant dense<0.000000e+00> : vector<8xf32>
    %72 = vector.multi_reduction <add>, %71, %cst_38 [1] : vector<8x8xf32> to vector<8xf32>
    %73 = vector.shape_cast %72 : vector<8xf32> to vector<8x1xf32>
    %74 = tpu.reciprocal %73 {approx = true} : vector<8x1xf32> -> vector<8x1xf32>
    %75 = vector.broadcast %74 : vector<8x1xf32> to vector<8x8xf32>
    %76 = arith.mulf %71, %75 : vector<8x8xf32>
    %77 = arith.truncf %76 : vector<8x8xf32> to vector<8x8xbf16>
    %cst_39 = arith.constant dense<0.000000e+00> : vector<8x8xf32>
    %78 = tpu.matmul %77, %63, %cst_39 {dimension_numbers = #tpu.dot_dimension_numbers<[1], [0], [0], [1], [0, 0, 1, 1], [], []>} : vector<8x8xbf16>, vector<8x8xbf16>, vector<8x8xf32> -> vector<8x8xf32>
    %c0_40 = arith.constant 0 : index
    %c16 = arith.constant 16 : index
    %79 = vector.load %arg18[%c0_40, %c16] : memref<8x32xf32, #tpu.memory_space<vmem>>, vector<8x8xf32>
    tpu.vector_store %arg18[%c0_40, %c16], %78 {strides = array<i32>} : memref<8x32xf32, #tpu.memory_space<vmem>>, vector<8x8xf32>,
    %80 = vector.extract_strided_slice %20 {offsets = [0, 24], sizes = [8, 8], strides = [1, 1]} : vector<8x32xbf16> to vector<8x8xbf16>
    %81 = vector.extract_strided_slice %21 {offsets = [0, 24], sizes = [8, 8], strides = [1, 1]} : vector<8x32xbf16> to vector<8x8xbf16>
    %82 = vector.extract_strided_slice %22 {offsets = [0, 24], sizes = [8, 8], strides = [1, 1]} : vector<8x32xbf16> to vector<8x8xbf16>
    %cst_41 = arith.constant dense<0.000000e+00> : vector<8x8xf32>
    %83 = tpu.matmul %80, %81, %cst_41 {dimension_numbers = #tpu.dot_dimension_numbers<[1], [1], [0], [0], [0, 0, 1, 0], [], []>} : vector<8x8xbf16>, vector<8x8xbf16>, vector<8x8xf32> -> vector<8x8xf32>
    %cst_42 = arith.constant 0.353553385 : f32
    %84 = vector.broadcast %cst_42 : f32 to vector<8x8xf32>
    %85 = arith.mulf %83, %84 : vector<8x8xf32>
    %cst_43 = arith.constant dense<0xFF800000> : vector<8xf32>
    %86 = vector.multi_reduction <maximumf>, %85, %cst_43 [1] : vector<8x8xf32> to vector<8xf32>
    %87 = vector.shape_cast %86 : vector<8xf32> to vector<8x1xf32>
    %88 = vector.broadcast %87 : vector<8x1xf32> to vector<8x8xf32>
    %89 = arith.subf %85, %88 : vector<8x8xf32>
    %90 = math.exp %89 : vector<8x8xf32>
    %cst_44 = arith.constant dense<0.000000e+00> : vector<8xf32>
    %91 = vector.multi_reduction <add>, %90, %cst_44 [1] : vector<8x8xf32> to vector<8xf32>
    %92 = vector.shape_cast %91 : vector<8xf32> to vector<8x1xf32>
    %93 = tpu.reciprocal %92 {approx = true} : vector<8x1xf32> -> vector<8x1xf32>
    %94 = vector.broadcast %93 : vector<8x1xf32> to vector<8x8xf32>
    %95 = arith.mulf %90, %94 : vector<8x8xf32>
    %96 = arith.truncf %95 : vector<8x8xf32> to vector<8x8xbf16>
    %cst_45 = arith.constant dense<0.000000e+00> : vector<8x8xf32>
    %97 = tpu.matmul %96, %82, %cst_45 {dimension_numbers = #tpu.dot_dimension_numbers<[1], [0], [0], [1], [0, 0, 1, 1], [], []>} : vector<8x8xbf16>, vector<8x8xbf16>, vector<8x8xf32> -> vector<8x8xf32>
    %c0_46 = arith.constant 0 : index
    %c24 = arith.constant 24 : index
    %98 = vector.load %arg18[%c0_46, %c24] : memref<8x32xf32, #tpu.memory_space<vmem>>, vector<8x8xf32>
    tpu.vector_store %arg18[%c0_46, %c24], %97 {strides = array<i32>} : memref<8x32xf32, #tpu.memory_space<vmem>>, vector<8x8xf32>,
    %c0_47 = arith.constant 0 : index
    %c0_48 = arith.constant 0 : index
    %99 = vector.load %arg18[%c0_47, %c0_48] : memref<8x32xf32, #tpu.memory_space<vmem>>, vector<8x32xf32>
    %100 = arith.addf %99, %7 : vector<8x32xf32>
    %cst_49 = arith.constant dense<0.000000e+00> : vector<8xf32>
    %101 = vector.multi_reduction <add>, %100, %cst_49 [1] : vector<8x32xf32> to vector<8xf32>
    %102 = vector.shape_cast %101 : vector<8xf32> to vector<8x1xf32>
    %cst_50 = arith.constant 3.200000e+01 : f32
    %103 = vector.broadcast %cst_50 : f32 to vector<8x1xf32>
    %104 = arith.divf %102, %103 : vector<8x1xf32>
    %105 = vector.broadcast %104 : vector<8x1xf32> to vector<8x32xf32>
    %106 = arith.subf %100, %105 : vector<8x32xf32>
    %107 = arith.mulf %106, %106 : vector<8x32xf32>
    %cst_51 = arith.constant dense<0.000000e+00> : vector<8xf32>
    %108 = vector.multi_reduction <add>, %107, %cst_51 [1] : vector<8x32xf32> to vector<8xf32>
    %109 = vector.shape_cast %108 : vector<8xf32> to vector<8x1xf32>
    %cst_52 = arith.constant 3.200000e+01 : f32
    %110 = vector.broadcast %cst_52 : f32 to vector<8x1xf32>
    %111 = arith.divf %109, %110 : vector<8x1xf32>
    %112 = vector.broadcast %104 : vector<8x1xf32> to vector<8x32xf32>
    %113 = arith.subf %100, %112 : vector<8x32xf32>
    %cst_53 = arith.constant 9.99999974E-6 : f32
    %114 = vector.broadcast %cst_53 : f32 to vector<8x1xf32>
    %115 = arith.addf %111, %114 : vector<8x1xf32>
    %116 = math.rsqrt %115 : vector<8x1xf32>
    %117 = vector.broadcast %116 : vector<8x1xf32> to vector<8x32xf32>
    %118 = arith.mulf %113, %117 : vector<8x32xf32>
    %119 = vector.broadcast %9 : vector<1x32xf32> to vector<8x32xf32>
    %120 = arith.mulf %118, %119 : vector<8x32xf32>
    %121 = vector.broadcast %10 : vector<1x32xf32> to vector<8x32xf32>
    %122 = arith.addf %120, %121 : vector<8x32xf32>
    %123 = arith.truncf %122 : vector<8x32xf32> to vector<8x32xbf16>
    %c0_54 = arith.constant 0 : index
    %c0_55 = arith.constant 0 : index
    %124 = vector.load %arg9[%c0_54, %c0_55] : memref<32x64xbf16, #tpu.memory_space<vmem>>, vector<32x64xbf16>
    %cst_56 = arith.constant dense<0.000000e+00> : vector<8x64xf32>
    %125 = tpu.matmul %123, %124, %cst_56 {dimension_numbers = #tpu.dot_dimension_numbers<[1], [0], [0], [1], [0, 0, 1, 1], [], []>} : vector<8x32xbf16>, vector<32x64xbf16>, vector<8x64xf32> -> vector<8x64xf32>
    %126 = vector.broadcast %11 : vector<1x64xf32> to vector<8x64xf32>
    %127 = arith.addf %125, %126 : vector<8x64xf32>
    %cst_57 = arith.constant 0.000000e+00 : f32
    %128 = vector.broadcast %cst_57 : f32 to vector<8x64xf32>
    %129 = arith.maximumf %127, %128 : vector<8x64xf32>
    %130 = arith.truncf %129 : vector<8x64xf32> to vector<8x64xbf16>
    %c0_58 = arith.constant 0 : index
    %c0_59 = arith.constant 0 : index
    %131 = vector.load %arg11[%c0_58, %c0_59] : memref<64x32xbf16, #tpu.memory_space<vmem>>, vector<64x32xbf16>
    %cst_60 = arith.constant dense<0.000000e+00> : vector<8x32xf32>
    %132 = tpu.matmul %130, %131, %cst_60 {dimension_numbers = #tpu.dot_dimension_numbers<[1], [0], [0], [1], [0, 0, 1, 1], [], []>} : vector<8x64xbf16>, vector<64x32xbf16>, vector<8x32xf32> -> vector<8x32xf32>
    %133 = vector.broadcast %12 : vector<1x32xf32> to vector<8x32xf32>
    %134 = arith.addf %132, %133 : vector<8x32xf32>
    %135 = arith.addf %134, %122 : vector<8x32xf32>
    %cst_61 = arith.constant dense<0.000000e+00> : vector<8xf32>
    %136 = vector.multi_reduction <add>, %135, %cst_61 [1] : vector<8x32xf32> to vector<8xf32>
    %137 = vector.shape_cast %136 : vector<8xf32> to vector<8x1xf32>
    %cst_62 = arith.constant 3.200000e+01 : f32
    %138 = vector.broadcast %cst_62 : f32 to vector<8x1xf32>
    %139 = arith.divf %137, %138 : vector<8x1xf32>
    %140 = vector.broadcast %139 : vector<8x1xf32> to vector<8x32xf32>
    %141 = arith.subf %135, %140 : vector<8x32xf32>
    %142 = arith.mulf %141, %141 : vector<8x32xf32>
    %cst_63 = arith.constant dense<0.000000e+00> : vector<8xf32>
    %143 = vector.multi_reduction <add>, %142, %cst_63 [1] : vector<8x32xf32> to vector<8xf32>
    %144 = vector.shape_cast %143 : vector<8xf32> to vector<8x1xf32>
    %cst_64 = arith.constant 3.200000e+01 : f32
    %145 = vector.broadcast %cst_64 : f32 to vector<8x1xf32>
    %146 = arith.divf %144, %145 : vector<8x1xf32>
    %147 = vector.broadcast %139 : vector<8x1xf32> to vector<8x32xf32>
    %148 = arith.subf %135, %147 : vector<8x32xf32>
    %cst_65 = arith.constant 9.99999974E-6 : f32
    %149 = vector.broadcast %cst_65 : f32 to vector<8x1xf32>
    %150 = arith.addf %146, %149 : vector<8x1xf32>
    %151 = math.rsqrt %150 : vector<8x1xf32>
    %152 = vector.broadcast %151 : vector<8x1xf32> to vector<8x32xf32>
    %153 = arith.mulf %148, %152 : vector<8x32xf32>
    %154 = vector.broadcast %13 : vector<1x32xf32> to vector<8x32xf32>
    %155 = arith.mulf %153, %154 : vector<8x32xf32>
    %156 = vector.broadcast %14 : vector<1x32xf32> to vector<8x32xf32>
    %157 = arith.addf %155, %156 : vector<8x32xf32>
    %c0_66 = arith.constant 0 : index
    %c0_67 = arith.constant 0 : index
    %c0_68 = arith.constant 0 : index
    %158 = vector.load %arg15[%c0_66, %c0_67, %c0_68] : memref<1x8x32xf32, #tpu.memory_space<vmem>>, vector<1x8x32xf32>
    %159 = vector.shape_cast %158 : vector<1x8x32xf32> to vector<8x32xf32>
    %160 = vector.shape_cast %157 : vector<8x32xf32> to vector<1x8x32xf32>
    tpu.vector_store %arg15[%c0_66, %c0_67, %c0_68], %160 {strides = array<i32>} : memref<1x8x32xf32, #tpu.memory_space<vmem>>, vector<1x8x32xf32>,
    return
  }
  func.func @transform_0(%arg0: i32, %arg1: i32) -> (i32, i32, i32) {
    %c0_i32 = arith.constant 0 : i32
    %c0_i32_0 = arith.constant 0 : i32
    %c0_i32_1 = arith.constant 0 : i32
    return %arg0, %c0_i32, %c0_i32_0 : i32, i32, i32
  }
  func.func @transform_1(%arg0: i32, %arg1: i32) -> (i32, i32) {
    %c0_i32 = arith.constant 0 : i32
    %c0_i32_0 = arith.constant 0 : i32
    %c0_i32_1 = arith.constant 0 : i32
    return %c0_i32, %c0_i32_0 : i32, i32
  }
  func.func @transform_2(%arg0: i32, %arg1: i32) -> (i32, i32) {
    %c0_i32 = arith.constant 0 : i32
    %c0_i32_0 = arith.constant 0 : i32
    %c0_i32_1 = arith.constant 0 : i32
    return %c0_i32, %c0_i32_0 : i32, i32
  }
  func.func @transform_3(%arg0: i32, %arg1: i32) -> (i32, i32) {
    %c0_i32 = arith.constant 0 : i32
    %c0_i32_0 = arith.constant 0 : i32
    %c0_i32_1 = arith.constant 0 : i32
    return %c0_i32, %c0_i32_0 : i32, i32
  }
  func.func @transform_4(%arg0: i32, %arg1: i32) -> (i32, i32) {
    %c0_i32 = arith.constant 0 : i32
    %c0_i32_0 = arith.constant 0 : i32
    %c0_i32_1 = arith.constant 0 : i32
    return %c0_i32, %c0_i32_0 : i32, i32
  }
  func.func @transform_5(%arg0: i32, %arg1: i32) -> (i32, i32) {
    %c0_i32 = arith.constant 0 : i32
    %c0_i32_0 = arith.constant 0 : i32
    %c0_i32_1 = arith.constant 0 : i32
    return %c0_i32, %c0_i32_0 : i32, i32
  }
  func.func @transform_6(%arg0: i32, %arg1: i32) -> (i32, i32) {
    %c0_i32 = arith.constant 0 : i32
    %c0_i32_0 = arith.constant 0 : i32
    %c0_i32_1 = arith.constant 0 : i32
    return %c0_i32, %c0_i32_0 : i32, i32
  }
  func.func @transform_7(%arg0: i32, %arg1: i32) -> (i32, i32) {
    %c0_i32 = arith.constant 0 : i32
    %c0_i32_0 = arith.constant 0 : i32
    %c0_i32_1 = arith.constant 0 : i32
    return %c0_i32, %c0_i32_0 : i32, i32
  }
  func.func @transform_8(%arg0: i32, %arg1: i32) -> (i32, i32) {
    %c0_i32 = arith.constant 0 : i32
    %c0_i32_0 = arith.constant 0 : i32
    %c0_i32_1 = arith.constant 0 : i32
    return %c0_i32, %c0_i32_0 : i32, i32
  }
  func.func @transform_9(%arg0: i32, %arg1: i32) -> (i32, i32) {
    %c0_i32 = arith.constant 0 : i32
    %c0_i32_0 = arith.constant 0 : i32
    %c0_i32_1 = arith.constant 0 : i32
    return %c0_i32, %c0_i32_0 : i32, i32
  }
  func.func @transform_10(%arg0: i32, %arg1: i32) -> (i32, i32) {
    %c0_i32 = arith.constant 0 : i32
    %c0_i32_0 = arith.constant 0 : i32
    %c0_i32_1 = arith.constant 0 : i32
    return %c0_i32, %c0_i32_0 : i32, i32
  }
  func.func @transform_11(%arg0: i32, %arg1: i32) -> (i32, i32) {
    %c0_i32 = arith.constant 0 : i32
    %c0_i32_0 = arith.constant 0 : i32
    %c0_i32_1 = arith.constant 0 : i32
    return %c0_i32, %c0_i32_0 : i32, i32
  }
  func.func @transform_12(%arg0: i32, %arg1: i32) -> (i32, i32) {
    %c0_i32 = arith.constant 0 : i32
    %c0_i32_0 = arith.constant 0 : i32
    %c0_i32_1 = arith.constant 0 : i32
    return %c0_i32, %c0_i32_0 : i32, i32
  }
  func.func @transform_13(%arg0: i32, %arg1: i32) -> (i32, i32, i32) {
    %c0_i32 = arith.constant 0 : i32
    %c0_i32_0 = arith.constant 0 : i32
    return %arg0, %arg1, %c0_i32 : i32, i32, i32
  }
}

</mosaic_0001>

<bundles_post_ra>
// kernel: tpu_custom_call.1
= control target key start
LH: loop header
LB: loop body
LE: loop exit
PB: predicated region body
PF: predicated region fallthrough
CT: control target
= control target key end

     0   :  { %s3223_s0 = inlined_call_operand.hbm [shape: f32[2,8,32], index: 0, kind: input, shape index: {}]   ;;  %s3224_s1 = inlined_call_operand.hbm [shape: bf16[32,32], index: 1, kind: input, shape index: {}]   ;;  %s3225_s2 = inlined_call_operand.hbm [shape: f32[1,32], index: 2, kind: input, shape index: {}]   ;;  %s3226_s3 = inlined_call_operand.hbm [shape: bf16[32,64], index: 3, kind: input, shape index: {}]   ;;  %s3227_s4 = inlined_call_operand.hbm [shape: f32[1,64], index: 4, kind: input, shape index: {}]   ;;  %s3228_s5 = inlined_call_operand.hbm [shape: f32[1,32], index: 5, kind: input, shape index: {}]   ;;  %s3229_s6 = inlined_call_operand.hbm [shape: f32[1,32], index: 6, kind: input, shape index: {}]   ;;  %s3230_s7 = inlined_call_operand.hbm [shape: bf16[32,64], index: 7, kind: input, shape index: {}]   ;;  %s3231_s8 = inlined_call_operand.hbm [shape: f32[1,64], index: 8, kind: input, shape index: {}]   ;;  %s3232_s9 = inlined_call_operand.hbm [shape: bf16[64,32], index: 9, kind: input, shape index: {}]   ;;  %s3233_s10 = inlined_call_operand.hbm [shape: f32[1,32], index: 10, kind: input, shape index: {}]   ;;  %s3234_s11 = inlined_call_operand.hbm [shape: f32[1,32], index: 11, kind: input, shape index: {}]   ;;  %s3235_s12 = inlined_call_operand.hbm [shape: f32[1,32], index: 12, kind: input, shape index: {}]   ;;  %s3236_s13 = inlined_call_operand.hbm [shape: f32[2,8,32], index: 13, kind: output, shape index: {}]  }
   0x1   :  { %3250 = sst [smem:[#allocation40_spill]] %s3223_s0 }
   0x2   :  { %3251 = sst [smem:[#allocation41_spill]] %s3224_s1 }
   0x3   :  { %3252 = sst [smem:[#allocation42_spill]] %s3225_s2 }
   0x4   :  { %3253 = sst [smem:[#allocation43_spill]] %s3236_s13 }
   0x5   :  { %18 = vsyncpa [#allocation6], 0 }
   0x6   :  { %20 = vsyncpa [#allocation6 + $0x1], 0 }
   0x7   :  { %21 = vsyncpa [#allocation9], 0 }
   0x8   :  { %22 = vsyncpa [#allocation12], 0 }
   0x9   :  { %23 = vsyncpa [#allocation15], 0 }
   0xa   :  { %24 = vsyncpa [#allocation18], 0 }
   0xb   :  { %25 = vsyncpa [#allocation21], 0 }
   0xc   :  { %26 = vsyncpa [#allocation24], 0 }
   0xd   :  { %27 = vsyncpa [#allocation7], 0 }
   0xe   :  { %29 = vsyncpa [#allocation7 + $0x1], 0  ;;  %s2657_s25 = smov 0   ;;  %s2659_s26 = smov 0  }
   0xf   :  { %s2661_s27 = smov 0   ;;  %s2663_s28 = smov 0  }
  0x10   :  { %s2665_s29 = smov 0   ;;  %s2667_s30 = smov 0  }
  0x11 LB: > { %3254 = sst [smem:[#allocation35_spill]] %s2540_s25  ;;  %s3237_s14 = sadd.s32 4294967295, %s2560_s30   ;;  %s2560_s30 = sphi %s2667_s30, %s35_s30   ;;  %s2556_s29 = sphi %s2665_s29, %s3292_s29   ;;  %s2552_s28 = sphi %s2663_s28, %s3291_s28   ;;  %s2548_s27 = sphi %s2661_s27, %s3290_s27   ;;  %s2544_s26 = sphi %s2659_s26, %s3289_s26   ;;  %s2540_s25 = sphi %s2657_s25, %s3288_s25  }
  0x12   : > { %3255 = sst [smem:[#allocation36_spill]] %s2544_s26  ;;  %p1679_p0 = scmp.ge.s32.totalorder %s2560_s30, 1 }
  0x13   : > { %3256 = sst [smem:[#allocation37_spill]] %s2552_s28  ;;  %p2691_p1 = scmp.eq.s32.totalorder %s3237_s14, 0 }
  0x14   : > { %p358_p2 = scmp.lt.s32.totalorder %s2560_s30, 3  ;;  %s2562_s17 = smov [#allocation8]  }
  0x15   : > { %s3257_s15 = scalar_select %p2691_p1, 1, 0 }
  0x16   : > { %p2696_p3 = pnand %p1679_p0, %p358_p2  ;;  %s370_s18 = sshll.u32 %s2562_s17, 4  ;;  %s2700_s18 = int_to_ptr.vmem [resolvable:$true] %s370_s18 }
  0x17   : > { %3258 = sst [smem:[#allocation38_spill]] %s3257_s15  ;;  %s2563_s20 = smov [#allocation11]  }
  0x18   : > { %s3259_s16 = scalar_select %p2696_p3, 1, 0 }
  0x19   : > { %p1914_p4 = pneg %p2696_p3  ;;  %s394_s21 = sshll.u32 %s2563_s20, 4  ;;  %s2711_s21 = int_to_ptr.vmem [resolvable:$true] %s394_s21 }
  0x1a   : > { %3260 = sst [smem:[#allocation39_spill]] %s3259_s16  ;;  %s2564_s22 = smov [#allocation14]  }
  0x1b   : > { %p2707_p6 = pnand %p1914_p4, %p2691_p1  ;;  %s2713_s23 = sshll.u32 %s2564_s22, 4  ;;  %s420_s23 = int_to_ptr.vmem [resolvable:$true] %s2713_s23 }
  0x1c   : > { %s3262_s1 = sld [smem:[#allocation41_spill]] }
  0x1d   : > { %p2723_p8 = pneg %p2707_p6 }
  0x22   : > { %s2088_s14 = scalar_lea.hbm %s3262_s1, 256 }
  0x23   : > { %p2089_p7 = scmp.ne.s32.totalorder %s3262_s1, %s2088_s14  ;;  %p2095_p11 = scmp.lt.u32.totalorder %s2088_s14, %s3262_s1 }
  0x25   : > { %p2091_p9 = pnand %p2723_p8, %p2089_p7 }
  0x27   : > { %p2092_p10 = pneg %p2091_p9 }
  0x29   : > { %p2097_p12 = pnand %p2095_p11, %p2092_p10 }
  0x2b   : > { %2100 = shalt.err (!%p2097_p12)
}
  0x2c   : > { %s2101_s13 = scalar_lea.vmem %s2700_s18, 256  ;;  %p2109_p4 = scmp.lt.s32.totalorder %s2700_s18, %s2700_s18 }
  0x2d   : > { %p2102_p13 = scmp.ne.s32.totalorder %s2700_s18, %s2101_s13  ;;  %p2110_p5 = scmp.lt.s32.totalorder %s2101_s13, %s2101_s13 }
  0x2f   : > { %p2104_p0 = pnand %p2102_p13, %p2723_p8  ;;  %p2111_p7 = por %p2110_p5, %p2109_p4 }
  0x31   : > { %p2105_p2 = pneg %p2104_p0 }
  0x33   : > { %p2112_p9 = pnand %p2111_p7, %p2105_p2 }
  0x35   : > { %2115 = shalt.err (!%p2112_p9)
}
  0x36   : > { %s3247_s28 = smov 64   ;;  %s2566_s14 = smov 4  }
  0x37   : > { %1917 = dma.hbm_to_vmem [thread:$0]  (!%p2707_p6), %s3262_s1, 256, %s2700_s18, [#allocation9], %s3247_s28, %s3247_s28, %s2566_s14  }
  0x38   : > { %s2116_s13 = scalar_lea.hbm %s3226_s3, 256 }
  0x39   : > { %p2117_p5 = scmp.ne.s32.totalorder %s3226_s3, %s2116_s13  ;;  %p2123_p12 = scmp.lt.u32.totalorder %s2116_s13, %s3226_s3 }
  0x3b   : > { %p2119_p10 = pnand %p2117_p5, %p2723_p8 }
  0x3d   : > { %p2120_p11 = pneg %p2119_p10 }
  0x3f   : > { %p2125_p13 = pnand %p2123_p12, %p2120_p11 }
  0x41   : > { %2128 = shalt.err (!%p2125_p13)
}
  0x42   : > { %s2129_s18 = scalar_lea.vmem %s2711_s21, 256  ;;  %p2137_p7 = scmp.lt.s32.totalorder %s2711_s21, %s2711_s21 }
  0x43   : > { %p2130_p0 = scmp.ne.s32.totalorder %s2711_s21, %s2129_s18  ;;  %p2138_p9 = scmp.lt.s32.totalorder %s2129_s18, %s2129_s18 }
  0x45   : > { %p2132_p2 = pnand %p2130_p0, %p2723_p8  ;;  %p2139_p5 = por %p2138_p9, %p2137_p7 }
  0x47   : > { %p2133_p4 = pneg %p2132_p2 }
  0x49   : > { %p2140_p10 = pnand %p2139_p5, %p2133_p4 }
  0x4b   : > { %2143 = shalt.err (!%p2140_p10)
}
  0x4c   : > { %1923 = dma.hbm_to_vmem [thread:$0]  (!%p2707_p6), %s3226_s3, 256, %s2711_s21, [#allocation12], %s3247_s28, %s3247_s28, %s2566_s14  }
  0x4d   : > { %s2144_s24 = scalar_lea.hbm %s3228_s5, 16 }
  0x4e   : > { %p2145_p11 = scmp.ne.s32.totalorder %s3228_s5, %s2144_s24  ;;  %p2151_p0 = scmp.lt.u32.totalorder %s2144_s24, %s3228_s5 }
  0x50   : > { %p2147_p12 = pnand %p2145_p11, %p2723_p8 }
  0x52   : > { %p2148_p13 = pneg %p2147_p12 }
  0x54   : > { %p2153_p2 = pnand %p2151_p0, %p2148_p13 }
  0x56   : > { %2156 = shalt.err (!%p2153_p2)
}
  0x57   : > { %s2157_s18 = scalar_lea.vmem %s420_s23, 16  ;;  %s2164_s21 = scalar_lea.vmem %s420_s23, 32 }
  0x58   : > { %p2158_p4 = scmp.ne.s32.totalorder %s420_s23, %s2157_s18  ;;  %p2165_p5 = scmp.lt.s32.totalorder %s420_s23, %s420_s23 }
  0x59   : > { %p2166_p10 = scmp.lt.s32.totalorder %s2164_s21, %s2157_s18 }
  0x5a   : > { %p2160_p7 = pnand %p2158_p4, %p2723_p8 }
  0x5b   : > { %p2167_p3 = por %p2166_p10, %p2165_p5 }
  0x5c   : > { %p2161_p9 = pneg %p2160_p7 }
  0x5e   : > { %p2168_p1 = pnand %p2167_p3, %p2161_p9 }
  0x60   : > { %2171 = shalt.err (!%p2168_p1)
}
  0x61   : > { %1929 = dma.hbm_to_vmem [thread:$0]  (!%p2707_p6), %s3228_s5, 16, %s420_s23, [#allocation15]  }
  0x62   : > { %s2567_s26 = smov [#allocation17]   ;;  %s2568_s24 = smov [#allocation20]  }
  0x63   : > { %s440_s15 = sshll.u32 %s2567_s26, 4  ;;  %s464_s17 = sshll.u32 %s2568_s24, 4  ;;  %s441_s15 = int_to_ptr.vmem [resolvable:$true] %s440_s15  ;;  %s465_s17 = int_to_ptr.vmem [resolvable:$true] %s464_s17 }
  0x64   : > { %s2172_s13 = scalar_lea.hbm %s3230_s7, 256 }
  0x65   : > { %p2173_p1 = scmp.ne.s32.totalorder %s3230_s7, %s2172_s13  ;;  %p2179_p12 = scmp.lt.u32.totalorder %s2172_s13, %s3230_s7 }
  0x67   : > { %p2175_p3 = pnand %p2173_p1, %p2723_p8 }
  0x69   : > { %p2176_p11 = pneg %p2175_p3 }
  0x6b   : > { %p2181_p13 = pnand %p2179_p12, %p2176_p11 }
  0x6d   : > { %2184 = shalt.err (!%p2181_p13)
}
  0x6e   : > { %s2185_s23 = scalar_lea.vmem %s441_s15, 256  ;;  %p2193_p7 = scmp.lt.s32.totalorder %s441_s15, %s441_s15 }
  0x6f   : > { %p2186_p0 = scmp.ne.s32.totalorder %s441_s15, %s2185_s23  ;;  %p2194_p9 = scmp.lt.s32.totalorder %s2185_s23, %s2185_s23 }
  0x71   : > { %p2188_p2 = pnand %p2186_p0, %p2723_p8  ;;  %p2195_p5 = por %p2194_p9, %p2193_p7 }
  0x73   : > { %p2189_p4 = pneg %p2188_p2 }
  0x75   : > { %p2196_p10 = pnand %p2195_p5, %p2189_p4 }
  0x77   : > { %2199 = shalt.err (!%p2196_p10)
}
  0x78   : > { %s3264_s25 = smov 64   ;;  %s2200_s22 = scalar_lea.hbm %s3232_s9, 512 }
  0x79   : > { %1935 = dma.hbm_to_vmem [thread:$0]  (!%p2707_p6), %s3230_s7, 256, %s441_s15, [#allocation18], %s3264_s25, %s3264_s25, %s2566_s14  }
  0x7a   : > { %p2201_p1 = scmp.ne.s32.totalorder %s3232_s9, %s2200_s22  ;;  %p2207_p12 = scmp.lt.u32.totalorder %s2200_s22, %s3232_s9 }
  0x7c   : > { %p2203_p3 = pnand %p2201_p1, %p2723_p8 }
  0x7e   : > { %p2204_p11 = pneg %p2203_p3 }
  0x80   : > { %p2209_p13 = pnand %p2207_p12, %p2204_p11 }
  0x82   : > { %2212 = shalt.err (!%p2209_p13)
}
  0x83   : > { %s2213_s23 = scalar_lea.vmem %s465_s17, 512  ;;  %p2221_p7 = scmp.lt.s32.totalorder %s465_s17, %s465_s17 }
  0x84   : > { %p2214_p0 = scmp.ne.s32.totalorder %s465_s17, %s2213_s23  ;;  %p2222_p9 = scmp.lt.s32.totalorder %s2213_s23, %s2213_s23 }
  0x86   : > { %p2216_p2 = pnand %p2214_p0, %p2723_p8  ;;  %p2223_p5 = por %p2222_p9, %p2221_p7 }
  0x88   : > { %p2217_p4 = pneg %p2216_p2 }
  0x8a   : > { %p2224_p10 = pnand %p2223_p5, %p2217_p4 }
  0x8c   : > { %2227 = shalt.err (!%p2224_p10)
}
  0x8d   : > { %1941 = dma.hbm_to_vmem [thread:$0]  (!%p2707_p6), %s3232_s9, 512, %s465_s17, [#allocation21], %s3264_s25, %s3264_s25, %s2566_s14  }
  0x8e   : > { %s2569_s26 = smov [#allocation23]   ;;  %s2570_s20 = smov [#allocation10]  }
  0x8f   : > { %s489_s24 = sshll.u32 %s2569_s26, 4  ;;  %s384_s22 = sshll.u32 %s2570_s20, 4  ;;  %s490_s24 = int_to_ptr.vmem [resolvable:$true] %s489_s24  ;;  %s385_s22 = int_to_ptr.vmem [resolvable:$true] %s384_s22 }
  0x90   : > { %s2228_s21 = scalar_lea.hbm %s3234_s11, 16 }
  0x91   : > { %p2229_p1 = scmp.ne.s32.totalorder %s3234_s11, %s2228_s21  ;;  %p2235_p12 = scmp.lt.u32.totalorder %s2228_s21, %s3234_s11 }
  0x93   : > { %p2231_p3 = pnand %p2229_p1, %p2723_p8 }
  0x95   : > { %p2232_p11 = pneg %p2231_p3 }
  0x97   : > { %p2237_p13 = pnand %p2235_p12, %p2232_p11 }
  0x99   : > { %2240 = shalt.err (!%p2237_p13)
}
  0x9a   : > { %s2241_s14 = scalar_lea.vmem %s490_s24, 16  ;;  %s2248_s17 = scalar_lea.vmem %s490_s24, 32 }
  0x9b   : > { %p2242_p0 = scmp.ne.s32.totalorder %s490_s24, %s2241_s14  ;;  %p2249_p7 = scmp.lt.s32.totalorder %s490_s24, %s490_s24 }
  0x9c   : > { %p2250_p9 = scmp.lt.s32.totalorder %s2248_s17, %s2241_s14 }
  0x9d   : > { %p2244_p2 = pnand %p2242_p0, %p2723_p8 }
  0x9e   : > { %p2251_p5 = por %p2250_p9, %p2249_p7 }
  0x9f   : > { %p2245_p4 = pneg %p2244_p2 }
  0xa1   : > { %p2252_p10 = pnand %p2251_p5, %p2245_p4 }
  0xa3   : > { %2255 = shalt.err (!%p2252_p10)
}
  0xa4   : > { %1947 = dma.hbm_to_vmem [thread:$0]  (!%p2707_p6), %s3234_s11, 16, %s490_s24, [#allocation24]  }
  0xa5   : > { %s3265_s2 = sld [smem:[#allocation42_spill]] }
  0xab   : > { %s2256_s20 = scalar_lea.hbm %s3265_s2, 16 }
  0xac   : > { %p2257_p1 = scmp.ne.s32.totalorder %s3265_s2, %s2256_s20  ;;  %p2263_p12 = scmp.lt.u32.totalorder %s2256_s20, %s3265_s2 }
  0xae   : > { %p2259_p3 = pnand %p2257_p1, %p2723_p8 }
  0xb0   : > { %p2260_p11 = pneg %p2259_p3 }
  0xb2   : > { %p2265_p13 = pnand %p2263_p12, %p2260_p11 }
  0xb4   : > { %2268 = shalt.err (!%p2265_p13)
}
  0xb5   : > { %s2269_s23 = scalar_lea.vmem %s385_s22, 16  ;;  %s2276_s24 = scalar_lea.vmem %s385_s22, 32 }
  0xb6   : > { %p2270_p0 = scmp.ne.s32.totalorder %s385_s22, %s2269_s23  ;;  %p2277_p7 = scmp.lt.s32.totalorder %s385_s22, %s385_s22 }
  0xb7   : > { %p2278_p9 = scmp.lt.s32.totalorder %s2276_s24, %s2269_s23 }
  0xb8   : > { %p2272_p2 = pnand %p2270_p0, %p2723_p8 }
  0xb9   : > { %p2279_p5 = por %p2278_p9, %p2277_p7 }
  0xba   : > { %p2273_p4 = pneg %p2272_p2 }
  0xbc   : > { %p2280_p10 = pnand %p2279_p5, %p2273_p4 }
  0xbe   : > { %2283 = shalt.err (!%p2280_p10)
}
  0xbf   : > { %1920 = dma.hbm_to_vmem [thread:$0]  (!%p2707_p6), %s3265_s2, 16, %s385_s22, [#allocation9]  }
  0xc0   : > { %s2571_s17 = smov [#allocation13]   ;;  %s2572_s28 = smov [#allocation16]  }
  0xc1   : > { %s408_s25 = sshll.u32 %s2571_s17, 4  ;;  %s430_s1 = sshll.u32 %s2572_s28, 4  ;;  %s409_s25 = int_to_ptr.vmem [resolvable:$true] %s408_s25  ;;  %s431_s1 = int_to_ptr.vmem [resolvable:$true] %s430_s1 }
  0xc2   : > { %s2284_s13 = scalar_lea.hbm %s3227_s4, 16 }
  0xc3   : > { %p2285_p1 = scmp.ne.s32.totalorder %s3227_s4, %s2284_s13  ;;  %p2291_p12 = scmp.lt.u32.totalorder %s2284_s13, %s3227_s4 }
  0xc5   : > { %p2287_p3 = pnand %p2285_p1, %p2723_p8 }
  0xc7   : > { %p2288_p11 = pneg %p2287_p3 }
  0xc9   : > { %p2293_p13 = pnand %p2291_p12, %p2288_p11 }
  0xcb   : > { %2296 = shalt.err (!%p2293_p13)
}
  0xcc   : > { %s2297_s22 = scalar_lea.vmem %s409_s25, 16  ;;  %s2304_s24 = scalar_lea.vmem %s409_s25, 32 }
  0xcd   : > { %p2298_p0 = scmp.ne.s32.totalorder %s409_s25, %s2297_s22  ;;  %p2305_p7 = scmp.lt.s32.totalorder %s409_s25, %s409_s25 }
  0xce   : > { %p2306_p9 = scmp.lt.s32.totalorder %s2304_s24, %s2297_s22 }
  0xcf   : > { %p2300_p2 = pnand %p2298_p0, %p2723_p8 }
  0xd0   : > { %p2307_p5 = por %p2306_p9, %p2305_p7 }
  0xd1   : > { %p2301_p4 = pneg %p2300_p2 }
  0xd3   : > { %p2308_p10 = pnand %p2307_p5, %p2301_p4 }
  0xd5   : > { %2311 = shalt.err (!%p2308_p10)
}
  0xd6   : > { %1926 = dma.hbm_to_vmem [thread:$0]  (!%p2707_p6), %s3227_s4, 16, %s409_s25, [#allocation12]  }
  0xd7   : > { %s2312_s26 = scalar_lea.hbm %s3229_s6, 16 }
  0xd8   : > { %p2313_p1 = scmp.ne.s32.totalorder %s3229_s6, %s2312_s26  ;;  %p2319_p12 = scmp.lt.u32.totalorder %s2312_s26, %s3229_s6 }
  0xda   : > { %p2315_p3 = pnand %p2313_p1, %p2723_p8 }
  0xdc   : > { %p2316_p11 = pneg %p2315_p3 }
  0xde   : > { %p2321_p13 = pnand %p2319_p12, %p2316_p11 }
  0xe0   : > { %2324 = shalt.err (!%p2321_p13)
}
  0xe1   : > { %s2325_s0 = scalar_lea.vmem %s431_s1, 16  ;;  %s2332_s25 = scalar_lea.vmem %s431_s1, 32 }
  0xe2   : > { %p2326_p0 = scmp.ne.s32.totalorder %s431_s1, %s2325_s0  ;;  %p2333_p7 = scmp.lt.s32.totalorder %s431_s1, %s431_s1 }
  0xe3   : > { %p2334_p9 = scmp.lt.s32.totalorder %s2332_s25, %s2325_s0 }
  0xe4   : > { %p2328_p2 = pnand %p2326_p0, %p2723_p8 }
  0xe5   : > { %p2335_p5 = por %p2334_p9, %p2333_p7 }
  0xe6   : > { %p2329_p4 = pneg %p2328_p2 }
  0xe8   : > { %p2336_p10 = pnand %p2335_p5, %p2329_p4 }
  0xea   : > { %2339 = shalt.err (!%p2336_p10)
}
  0xeb   : > { %1932 = dma.hbm_to_vmem [thread:$0]  (!%p2707_p6), %s3229_s6, 16, %s431_s1, [#allocation15]  }
  0xec   : > { %s2573_s24 = smov [#allocation19]   ;;  %s2574_s14 = smov [#allocation22]  }
  0xed   : > { %s454_s15 = sshll.u32 %s2573_s24, 4  ;;  %s478_s17 = sshll.u32 %s2574_s14, 4  ;;  %s455_s15 = int_to_ptr.vmem [resolvable:$true] %s454_s15  ;;  %s479_s17 = int_to_ptr.vmem [resolvable:$true] %s478_s17 }
  0xee   : > { %s2340_s20 = scalar_lea.hbm %s3231_s8, 16 }
  0xef   : > { %p2341_p1 = scmp.ne.s32.totalorder %s3231_s8, %s2340_s20  ;;  %p2347_p12 = scmp.lt.u32.totalorder %s2340_s20, %s3231_s8 }
  0xf1   : > { %p2343_p3 = pnand %p2341_p1, %p2723_p8 }
  0xf3   : > { %p2344_p11 = pneg %p2343_p3 }
  0xf5   : > { %p2349_p13 = pnand %p2347_p12, %p2344_p11 }
  0xf7   : > { %2352 = shalt.err (!%p2349_p13)
}
  0xf8   : > { %s2353_s1 = scalar_lea.vmem %s455_s15, 16  ;;  %s2360_s25 = scalar_lea.vmem %s455_s15, 32 }
  0xf9   : > { %p2354_p0 = scmp.ne.s32.totalorder %s455_s15, %s2353_s1  ;;  %p2361_p7 = scmp.lt.s32.totalorder %s455_s15, %s455_s15 }
  0xfa   : > { %p2362_p9 = scmp.lt.s32.totalorder %s2360_s25, %s2353_s1 }
  0xfb   : > { %p2356_p2 = pnand %p2354_p0, %p2723_p8 }
  0xfc   : > { %p2363_p5 = por %p2362_p9, %p2361_p7 }
  0xfd   : > { %p2357_p4 = pneg %p2356_p2 }
  0xff   : > { %p2364_p10 = pnand %p2363_p5, %p2357_p4 }
 0x101   : > { %2367 = shalt.err (!%p2364_p10)
}
 0x102   : > { %1938 = dma.hbm_to_vmem [thread:$0]  (!%p2707_p6), %s3231_s8, 16, %s455_s15, [#allocation18]  }
 0x103   : > { %s2368_s28 = scalar_lea.hbm %s3233_s10, 16 }
 0x104   : > { %p2369_p1 = scmp.ne.s32.totalorder %s3233_s10, %s2368_s28  ;;  %p2375_p12 = scmp.lt.u32.totalorder %s2368_s28, %s3233_s10 }
 0x106   : > { %p2371_p3 = pnand %p2369_p1, %p2723_p8 }
 0x108   : > { %p2372_p11 = pneg %p2371_p3 }
 0x10a   : > { %p2377_p13 = pnand %p2375_p12, %p2372_p11 }
 0x10c   : > { %2380 = shalt.err (!%p2377_p13)
}
 0x10d   : > { %s2381_s21 = scalar_lea.vmem %s479_s17, 16  ;;  %s2388_s15 = scalar_lea.vmem %s479_s17, 32 }
 0x10e   : > { %p2382_p0 = scmp.ne.s32.totalorder %s479_s17, %s2381_s21  ;;  %p2389_p7 = scmp.lt.s32.totalorder %s479_s17, %s479_s17 }
 0x10f   : > { %p2390_p9 = scmp.lt.s32.totalorder %s2388_s15, %s2381_s21 }
 0x110   : > { %p2384_p2 = pnand %p2382_p0, %p2723_p8 }
 0x111   : > { %p2391_p5 = por %p2390_p9, %p2389_p7 }
 0x112   : > { %p2385_p4 = pneg %p2384_p2 }
 0x114   : > { %p2392_p10 = pnand %p2391_p5, %p2385_p4 }
 0x116   : > { %2395 = shalt.err (!%p2392_p10)
}
 0x117   : > { %1944 = dma.hbm_to_vmem [thread:$0]  (!%p2707_p6), %s3233_s10, 16, %s479_s17, [#allocation21]  }
 0x118   : > { %s2575_s25 = smov [#allocation25]   ;;  %s2396_s14 = scalar_lea.hbm %s3235_s12, 16 }
 0x119   : > { %s500_s23 = sshll.u32 %s2575_s25, 4  ;;  %p2397_p1 = scmp.ne.s32.totalorder %s3235_s12, %s2396_s14  ;;  %s501_s23 = int_to_ptr.vmem [resolvable:$true] %s500_s23 }
 0x11a   : > { %p2403_p12 = scmp.lt.u32.totalorder %s2396_s14, %s3235_s12 }
 0x11b   : > { %p2399_p3 = pnand %p2397_p1, %p2723_p8 }
 0x11d   : > { %p2400_p11 = pneg %p2399_p3 }
 0x11f   : > { %p2405_p13 = pnand %p2403_p12, %p2400_p11 }
 0x121   : > { %2408 = shalt.err (!%p2405_p13)
}
 0x122   : > { %s2409_s17 = scalar_lea.vmem %s501_s23, 16  ;;  %s2416_s18 = scalar_lea.vmem %s501_s23, 32 }
 0x123   : > { %p2410_p0 = scmp.ne.s32.totalorder %s501_s23, %s2409_s17  ;;  %p2417_p7 = scmp.lt.s32.totalorder %s501_s23, %s501_s23 }
 0x124   : > { %p2418_p9 = scmp.lt.s32.totalorder %s2416_s18, %s2409_s17 }
 0x125   : > { %p2412_p2 = pnand %p2410_p0, %p2723_p8 }
 0x126   : > { %p2419_p5 = por %p2418_p9, %p2417_p7 }
 0x127   : > { %p2413_p4 = pneg %p2412_p2 }
 0x129   : > { %p2420_p10 = pnand %p2419_p5, %p2413_p4 }
 0x12b   : > { %2423 = shalt.err (!%p2420_p10)
}
 0x12c   : > { %s3266_s0 = sld [smem:[#allocation36_spill]]  ;;  %s3267_s16 = sld [smem:[#allocation35_spill]] }
 0x12d   : > { %s3268_s1 = sld [smem:[#allocation38_spill]]  ;;  %s1678_s25 = sadd.s32 4294967294, %s2560_s30  }
 0x12e   : > { %1950 = dma.hbm_to_vmem [thread:$0]  (!%p2707_p6), %s3235_s12, 16, %s501_s23, [#allocation24]  }
 0x12f   : > { %s47_s22 = sadd.s32 1, %s2556_s29  ;;  %s54_s19 = sadd.s32 1, %s2548_s27 }
 0x130   : > { %p49_p8 = scmp.ge.s32.totalorder %s47_s22, 2  ;;  %p62_p3 = scmp.eq.s32.totalorder %s2560_s30, 0 }
 0x131   : > { %s3270_s14 = sadd.s32 4294967295, %s2560_s30   ;;  %p351_p7 = scmp.eq.s32.totalorder %s1678_s25, 1 }
 0x132   : > { %p61_p1 = scmp.ne.s32.totalorder %s2548_s27, %s3266_s0  ;;  %s3294_s22 = smov (%p49_p8, %s47_s22), 0 }
 0x133   : > { %p67_p12 = scmp.ne.s32.totalorder %s3266_s0, %s3267_s16  ;;  %s51_s23 = ssub.s32 %s2556_s29, %s3294_s22 }
 0x134   : > { %p2968_p11 = por %p62_p3, %p61_p1  ;;  %p345_p6 = scmp.eq.s32.totalorder %s3270_s14, 1 }
 0x135   : > { %p52_p13 = scmp.eq.s32.totalorder %s51_s23, 0  ;;  %p3271_p0 = scmp.ne.s32.totalorder %s3268_s1, 0 }
 0x136   : > { %p2984_p4 = por %p345_p6, %p61_p1  ;;  %p2991_p9 = por %p351_p7, %p67_p12 }
 0x137   : > { %p2980_p2 = por %p3271_p0, %p67_p12  ;;  %p1971_p5 = scmp.lt.s32.totalorder %s2560_s30, 2 }
 0x138   : > { %s3273_s26 = scalar_select %p2984_p4, 1, 0 }
 0x139   : > { %s2989_s20 = scalar_select %p52_p13, %s2548_s27, %s54_s19  }
 0x13a   : > { %s3274_s13 = scalar_select %p2991_p9, 1, 0 }
 0x13b   : > { %s511_s17 = sand.u32 1, %s2548_s27   ;;  %s1694_s18 = sshll.u32 %s2556_s29, 7 }
 0x13c   : > { %s1693_s21 = sshll.u32 %s511_s17, 3  ;;  %s3275_s16 = sld [smem:[#allocation40_spill]] }
 0x13d   : > { %s515_s25 = scalar_lea.vmem [#allocation5], %s1693_s21  ;;  %p3005_p10 = pnand %p1971_p5, %p2968_p11 }
 0x13e   : > { %s522_s19 = sshll.u32 %s515_s25, 4  ;;  %s512_s14 = scalar_lea.sflag [#allocation6], %s511_s17  ;;  %s3009_s19 = int_to_ptr.vmem [resolvable:$true] %s522_s19 }
 0x13f   : > { %p2426_p1 = pneg %p3005_p10 }
 0x142   : > { %s3001_s1 = scalar_lea.hbm %s3275_s16, %s1694_s18  ;;  %s2429_s24 = scalar_lea.hbm %s3275_s16, 256 }
 0x143   : > { %s2424_s2 = scalar_lea.hbm %s3001_s1, 128  ;;  %p2430_p11 = scmp.lt.u32.totalorder %s3001_s1, %s3275_s16 }
 0x144   : > { %p2425_p8 = scmp.ne.s32.totalorder %s3001_s1, %s2424_s2  ;;  %p2431_p6 = scmp.lt.u32.totalorder %s2429_s24, %s2424_s2 }
 0x145   : > { %p2433_p0 = scmp.lt.u32.totalorder %s2424_s2, %s3001_s1 }
 0x146   : > { %p2427_p3 = pnand %p2426_p1, %p2425_p8  ;;  %p2432_p13 = por %p2431_p6, %p2430_p11 }
 0x148   : > { %p2428_p12 = pneg %p2427_p3  ;;  %p2434_p7 = por %p2433_p0, %p2432_p13 }
 0x14a   : > { %p2435_p5 = pnand %p2434_p7, %p2428_p12 }
 0x14c   : > { %2438 = shalt.err (!%p2435_p5)
}
 0x14d   : > { %s2439_s17 = scalar_lea.vmem %s3009_s19, 128  ;;  %s2576_s25 = smov [#allocation5]  }
 0x14e   : > { %p2440_p8 = scmp.ne.s32.totalorder %s3009_s19, %s2439_s17  ;;  %s2444_s18 = sshll.u32 %s2576_s25, 4  ;;  %s2445_s18 = int_to_ptr.vmem [resolvable:$false] %s2444_s18 }
 0x14f   : > { %s2446_s21 = scalar_lea.vmem %s2445_s18, 256  ;;  %p2447_p4 = scmp.lt.s32.totalorder %s3009_s19, %s2445_s18 }
 0x150   : > { %p2442_p3 = pnand %p2440_p8, %p2426_p1  ;;  %p2448_p11 = scmp.lt.s32.totalorder %s2446_s21, %s2439_s17 }
 0x152   : > { %p2443_p9 = pneg %p2442_p3  ;;  %p2449_p6 = por %p2448_p11, %p2447_p4 }
 0x154   : > { %p2450_p13 = pnand %p2449_p6, %p2443_p9 }
 0x156   : > { %2453 = shalt.err (!%p2450_p13)
}
 0x157   : > { %1954 = dma.hbm_to_vmem [thread:$0]  (!%p3005_p10), %s3001_s1, 128, %s3009_s19, %s512_s14  }
 0x158   : > { %s3277_s2 = sld [smem:[#allocation39_spill]] }
 0x15e   : > { %p3278_p12 = scmp.ne.s32.totalorder %s3277_s2, 0 }
 0x15f   : > { %s3279_s24 = sld [smem:[#allocation36_spill]] (!%p3278_p12) }
 0x160   : > { %531 = sbr.rel (%p3278_p12) target bundleno = 2699 (0xa8b), region = 72 }
 0x165   : > { %s3039_s15 = sand.u32 (!%p3278_p12), 1, %s3279_s24  }
 0x166   : > { %s1696_s0 = sshll.u32 (!%p3278_p12), %s3039_s15, 3  ;;  %s534_s17 = scalar_lea.sflag (!%p3278_p12), [#allocation6], %s3039_s15 }
 0x167   : > { %s537_s25 = scalar_lea.vmem [#allocation5], %s1696_s0 }
 0x168   : > { %2507 = dma.done.wait (%p2980_p2), %s534_s17, 128  }
 0x169   : > { %2509 = vsyncadd (%p2980_p2), %s534_s17, 4294967168  ;;  %s3280_s1 = sld [smem:[#allocation38_spill]] }
 0x16f   : > { %p3281_p4 = scmp.ne.s32.totalorder %s3280_s1, 0 }
 0x171   : > { %2511 = dma.done.wait (%p3281_p4), [#allocation9], 272  }
 0x172   : > { %2513 = vsyncadd (%p3281_p4), [#allocation9], 4294967024 }
 0x173   : > { %2515 = dma.done.wait (%p3281_p4), [#allocation12], 272  }
 0x174   : > { %2517 = vsyncadd (%p3281_p4), [#allocation12], 4294967024 }
 0x175   : > { %2519 = dma.done.wait (%p3281_p4), [#allocation15], 32  }
 0x176   : > { %2521 = vsyncadd (%p3281_p4), [#allocation15], 4294967264 }
 0x177   : > { %2523 = dma.done.wait (%p3281_p4), [#allocation18], 272  }
 0x178   : > { %2525 = vsyncadd (%p3281_p4), [#allocation18], 4294967024 }
 0x179   : > { %2527 = dma.done.wait (%p3281_p4), [#allocation21], 528  }
 0x17a   : > { %2529 = vsyncadd (%p3281_p4), [#allocation21], 4294966768 }
 0x17b   : > { %2531 = dma.done.wait (%p3281_p4), [#allocation24], 32  }
 0x17c   : > { %2533 = vsyncadd (%p3281_p4), [#allocation24], 4294967264  ;;  %v2577_v0 = vmov 0.0   ;;  %vm2578_vm0 = vmmov 0   ;;  %v2056_v1 = vld [vmem:[#allocation11] sm:$0xff]   ;;  %v2057_v2 = vld [vmem:[#allocation11 + $0x8] sm:$0xff]  }
 0x17d   : > { %1778 = vmatprep.subr.bf16.mxu0 %v2577_v0  ;;  %1782 = vmatprep.mubr.msk.bf16.mxu0 %vm2578_vm0, %v2577_v0  ;;  %v3079_v3 = vld [vmem:[%s537_s25] sm:$0xff]  ;;  %v2058_v4 = vld [vmem:[#allocation8] sm:$0xff]   ;;  %vm658_vm1 = vcmask 261120   ;;  %v2059_v5 = vld [vmem:[#allocation8 + $0x8] sm:$0xff]   ;;  %vm703_vm2 = vcmask 257024   ;;  %vm792_vm3 = vcmask 64512  }
 0x17e   : > { %1786 = vmatprep.subr.bf16.mxu1 %v2577_v0  ;;  %1790 = vmatprep.mubr.msk.bf16.mxu1 %vm2578_vm0, %v2577_v0  ;;  %v634_v6 = vpack.c.bf16 %v3079_v3, %v3079_v3  ;;  %v1710_v7 = vld [vmem:[#allocation13] ss:$0 sm:$0xff]  ;;  %v1715_v18 = vld [vmem:[#allocation10] ss:$0 sm:$0xff]  ;;  %s2579_s28 = smov 112   ;;  %s2580_s19 = smov 120  }
 0x17f   : > { %1779 = vmatpush3.bf16.msra.mxu0 %v2056_v1  ;;  %1787 = vmatpush3.bf16.msra.mxu1 %v2058_v4  ;;  %s2581_s23 = smov 104   ;;  %s2582_s14 = smov 96   ;;  %vm855_vm4 = vcmask 1043456   ;;  %vm1022_vm5 = vcmask 130112   ;;  %vm1139_vm6 = vcmask 195712   ;;  %vm1256_vm7 = vcmask 261312  }
 0x180   : > { %1780 = vmatprep.subr.bf16.mxu0 %v2577_v0  ;;  %1788 = vmatprep.subr.bf16.mxu1 %v2577_v0  ;;  %s2583_s18 = smov 8   ;;  %s2584_s21 = smov 16   ;;  %vm1394_vm8 = vcmask 523264  }
 0x181   : > { %s2585_s2 = smov 24   ;;  %s3282_s24 = sld [smem:[#allocation37_spill]] }
 0x182   : > { %s627_s25 = scalar_lea.vmem [#allocation26], %s1696_s0  ;;  %p3284_p9 = scmp.ne.s32.totalorder %s3273_s26, 0 }
 0x183   : > { %1781 = vmatpush3.bf16.msra.mxu0 %v2057_v2  ;;  %1789 = vmatpush3.bf16.msra.mxu1 %v2059_v5  ;;  %s1482_s1 = sshll.u32 %s627_s25, 4  ;;  %s2586_s0 = smov [#allocation26]   ;;  %s3175_s1 = int_to_ptr.vmem [resolvable:$true] %s1482_s1 }
 0x184   : > { %1794 = vmatprep.subr.bf16.mxu0 %v2577_v0  ;;  %1800 = vmatprep.subr.bf16.mxu1 %v2577_v0 }
 0x186   : > { %1783 = vmatmul.mubr.msk.bf16.vlgmr.msra.gmra.mrb[0].mxu0 %vm658_vm1, %v634_v6  ;;  %1791 = vmatmul.mubr.msk.bf16.vlgmr.msra.gmra.mrb[0].mxu1 %vm658_vm1, %v634_v6 }
 0x187   : > { %1796 = vmatprep.mubr.msk.bf16.mxu0 %vm2578_vm0, %v2577_v0  ;;  %1802 = vmatprep.mubr.msk.bf16.mxu1 %vm2578_vm0, %v2577_v0  ;;  %s1744_s17 = sshll.u32 %s3282_s24, 7 }
 0x259   : > { %v696_v8 = vpop.f32.mrb[0].mxu0  ;;  %v783_v14 = vpop.f32.mrb[0].mxu1 }
 0x25a   : > { %v697_v9 = vadd.f32 %v1710_v7, %v696_v8  ;;  %v1784_v10 = vpop.f32.mrb[1].mxu0  ;;  %v1792_v15 = vpop.f32.mrb[1].mxu1  ;;  %v784_v19 = vadd.f32 %v1715_v18, %v783_v14 }
 0x25b   : > { %v699_v11 = vpop.f32.mrb[2].mxu0  ;;  %v786_v16 = vpop.f32.mrb[2].mxu1 }
 0x25c   : > { %v3093_v12 = vpack.c.bf16 %v697_v9, %v697_v9  ;;  %v1785_v13 = vpop.f32.mrb[3].mxu0  ;;  %v1793_v17 = vpop.f32.mrb[3].mxu1  ;;  %v789_v23 = vpack.c.bf16 %v784_v19, %v784_v19 }
 0x25e   : > { %704 = vst.msk [vmem:[#allocation2] sm:$0xf] %vm703_vm2, %v3093_v12 }
 0x265   : > { %v790_v20 = vld [vmem:[#allocation2] sm:$0xf] }
 0x266   : > { %v797_v21 = vsel %vm792_vm3, %v790_v20, 0  ;;  %v1721_v22 = vcombine.low %v790_v20, %v790_v20 }
 0x267   : > { %1795 = vmatpush3.bf16.xpose.msra.mxu0 %v797_v21 }
 0x268   : > { %1026 = vrot.lane.b32.xlu1 %v1721_v22, %s2579_s28  ;;  %906 = vrot.lane.b32.xlu0 %v1721_v22, %s2580_s19 }
 0x269   : > { %1806 = vmatprep.subr.bf16.mxu0 %v2577_v0 }
 0x26c   : > { %1024 = vrot.lane.b32.xlu1 %v789_v23, %s2579_s28  ;;  %901 = vrot.lane.b32.xlu0 %v789_v23, %s2580_s19 }
 0x26e   : > { %1797 = vmatmul.mubr.msk.bf16.vlgmr.msra.gmra.mrb[4].mxu0 %vm792_vm3, %v789_v23 }
 0x26f   : > { %1808 = vmatprep.mubr.msk.bf16.mxu0 %vm2578_vm0, %v2577_v0 }
 0x270   : > { %1141 = vrot.lane.b32.xlu1 %v789_v23, %s2581_s23  ;;  %1143 = vrot.lane.b32.xlu0 %v1721_v22, %s2581_s23 }
 0x2da   : > { %v907_v24 = vpop.permute.xlu0 %906  ;;  %v1027_v26 = vpop.permute.xlu1 %1026 }
 0x2db   : > { %v912_v25 = vsel %vm792_vm3, %v907_v24, 0  ;;  %v1032_v28 = vsel %vm792_vm3, %v1027_v26, 0 }
 0x2dc   : > { %1807 = vmatpush3.bf16.xpose.msra.mxu0 %v912_v25 }
 0x2dd   : > { %1818 = vmatprep.subr.bf16.mxu0 %v2577_v0 }
 0x2de   : > { %v902_v27 = vpop.permute.xlu0 %901  ;;  %v1025_v30 = vpop.permute.xlu1 %1024 }
 0x2e2   : > { %v1144_v29 = vpop.permute.xlu0 %1143  ;;  %v1142_v32 = vpop.permute.xlu1 %1141 }
 0x2e3   : > { %1809 = vmatmul.mubr.msk.bf16.vlgmr.msra.gmra.mrb[8].mxu0 %vm792_vm3, %v902_v27  ;;  %v1149_v31 = vsel %vm792_vm3, %v1144_v29, 0 }
 0x2e4   : > { %1819 = vmatpush3.bf16.xpose.msra.mxu0 %v1032_v28  ;;  %1820 = vmatprep.mubr.msk.bf16.mxu0 %vm2578_vm0, %v2577_v0 }
 0x2e5   : > { %1830 = vmatprep.subr.bf16.mxu0 %v2577_v0 }
 0x2eb   : > { %1821 = vmatmul.mubr.msk.bf16.vlgmr.msra.gmra.mrb[12].mxu0 %vm792_vm3, %v1025_v30 }
 0x2ec   : > { %1831 = vmatpush3.bf16.xpose.msra.mxu0 %v1149_v31  ;;  %1832 = vmatprep.mubr.msk.bf16.mxu0 %vm2578_vm0, %v2577_v0 }
 0x2ed   : > { %1842 = vmatprep.subr.bf16.mxu0 %v2577_v0 }
 0x2f3   : > { %1833 = vmatmul.mubr.msk.bf16.vlgmr.msra.gmra.mrb[16].mxu0 %vm792_vm3, %v1142_v32 }
 0x2f4   : > { %1846 = vmatprep.mubr.msk.bf16.mxu0 %vm2578_vm0, %v2577_v0 }
 0x341   : > { %v833_v33 = vpop.f32.mrb[4].mxu0 }
 0x342   : > { %v839_v34 = vmul.f32 0.35355338, %v833_v33  ;;  %v1798_v35 = vpop.f32.mrb[5].mxu0 }
 0x343   : > { %v836_v36 = vpop.f32.mrb[6].mxu0 }
 0x344   : > { %v1799_v37 = vpop.f32.mrb[7].mxu0  ;;  %v840_v38 = vsel %vm792_vm3, %v839_v34, -inf }
 0x345   : > { %841 = vmax.xlane.f32.xlu0 %v840_v38 }
 0x3b6   : > { %v948_v39 = vpop.f32.mrb[8].mxu0 }
 0x3b7   : > { %v954_v40 = vmul.f32 0.35355338, %v948_v39  ;;  %v1810_v41 = vpop.f32.mrb[9].mxu0 }
 0x3b8   : > { %v951_v42 = vpop.f32.mrb[10].mxu0 }
 0x3b9   : > { %v1811_v43 = vpop.f32.mrb[11].mxu0  ;;  %v955_v44 = vsel %vm792_vm3, %v954_v40, -inf }
 0x3ba   : > { %956 = vmax.xlane.f32.xlu1 %v955_v44 }
 0x3be   : > { %v1068_v45 = vpop.f32.mrb[12].mxu0 }
 0x3bf   : > { %v1074_v46 = vmul.f32 0.35355338, %v1068_v45  ;;  %v1822_v47 = vpop.f32.mrb[13].mxu0 }
 0x3c0   : > { %v1071_v48 = vpop.f32.mrb[14].mxu0 }
 0x3c1   : > { %v1823_v49 = vpop.f32.mrb[15].mxu0  ;;  %v1075_v50 = vsel %vm792_vm3, %v1074_v46, -inf }
 0x3c2   : > { %1076 = vmax.xlane.f32.xlu0 %v1075_v50 }
 0x3c6   : > { %v1185_v51 = vpop.f32.mrb[16].mxu0 }
 0x3c7   : > { %v1191_v52 = vmul.f32 0.35355338, %v1185_v51  ;;  %v1834_v53 = vpop.f32.mrb[17].mxu0 }
 0x3c8   : > { %v1188_v54 = vpop.f32.mrb[18].mxu0 }
 0x3c9   : > { %v1835_v55 = vpop.f32.mrb[19].mxu0  ;;  %v1192_v56 = vsel %vm792_vm3, %v1191_v52, -inf }
 0x3ca   : > { %1193 = vmax.xlane.f32.xlu0 %v1192_v56 }
 0x3cb   : > { %708 = vrot.lane.b32.xlu1 %v3093_v12, %s2582_s14 }
 0x3d2   : > { %v842_v57 = vpop.xlane.xlu0 %841 }
 0x3d3   : > { %v843_v58 = vsub.f32 %v839_v34, %v842_v57 }
 0x3d5   : > { %v844_v59 = vmul.f32 1.442695, %v843_v58 }
 0x3d7   : > { %2068 = vpow2.f32 %v844_v59 }
 0x3e1   : > { %v2069_v60 = vpop.eup %2068 }
 0x3e2   : > { %v846_v61 = vsel %vm792_vm3, %v2069_v60, 0.0 }
 0x3e3   : > { %847 = vadd.xlane.f32.xlu0 %v846_v61 }
 0x447   : > { %v957_v62 = vpop.xlane.xlu1 %956 }
 0x448   : > { %v958_v63 = vsub.f32 %v954_v40, %v957_v62 }
 0x44a   : > { %v959_v1 = vmul.f32 1.442695, %v958_v63 }
 0x44b   : > { %v709_v2 = vpop.permute.xlu1 %708 }
 0x44c   : > { %2070 = vpow2.f32 %v959_v1  ;;  %711 = vst.msk [vmem:[#allocation3] sm:$0xf] %vm703_vm2, %v709_v2 }
 0x44f   : > { %v1077_v4 = vpop.xlane.xlu0 %1076 }
 0x450   : > { %v1078_v5 = vsub.f32 %v1074_v46, %v1077_v4 }
 0x452   : > { %v1079_v6 = vmul.f32 1.442695, %v1078_v5 }
 0x453   : > { %v791_v7 = vld [vmem:[#allocation3] sm:$0xf] }
 0x454   : > { %2072 = vpow2.f32 %v1079_v6  ;;  %v857_v8 = vsel %vm855_vm4, %v791_v7, 0  ;;  %v1723_v9 = vcombine.low %v791_v7, %v791_v7  ;;  %v2062_v6 = vld [vmem:[#allocation17] sm:$0xff]   ;;  %v2063_v7 = vld [vmem:[#allocation17 + $0x8] sm:$0xff]  }
 0x455   : > { %1801 = vmatpush3.bf16.msra.mxu1 %v857_v8  ;;  %1843 = vmatpush3.bf16.msra.mxu0 %v2062_v6  ;;  %v2064_v8 = vld [vmem:[#allocation20] sm:$0xff]  }
 0x456   : > { %v2071_v10 = vpop.eup %2070  ;;  %970 = vrot.lane.b32.xlu1 %v1723_v9, %s2580_s19  ;;  %1812 = vmatprep.subr.bf16.mxu1 %v2577_v0 }
 0x457   : > { %v1194_v11 = vpop.xlane.xlu0 %1193  ;;  %v961_v12 = vsel %vm792_vm3, %v2071_v10, 0.0  ;;  %1844 = vmatprep.subr.bf16.mxu0 %v2577_v0 }
 0x458   : > { %v1195_v13 = vsub.f32 %v1191_v52, %v1194_v11  ;;  %962 = vadd.xlane.f32.xlu0 %v961_v12 }
 0x459   : > { %1845 = vmatpush3.bf16.msra.mxu0 %v2063_v7 }
 0x45a   : > { %v1196_v14 = vmul.f32 1.442695, %v1195_v13  ;;  %1204 = vrot.lane.b32.xlu1 %v1723_v9, %s2581_s23  ;;  %v1729_v13 = vld [vmem:[#allocation14] ss:$0 sm:$0xff]  ;;  %s3283_s23 = sld [smem:[#allocation43_spill]] }
 0x45c   : > { %2074 = vpow2.f32 %v1196_v14 }
 0x45e   : > { %v2073_v15 = vpop.eup %2072 }
 0x45f   : > { %v1081_v16 = vsel %vm792_vm3, %v2073_v15, 0.0 }
 0x460   : > { %1082 = vadd.xlane.f32.xlu0 %v1081_v16  ;;  %s3173_s14 = scalar_lea.hbm %s3283_s23, %s1744_s17 }
 0x466   : > { %v2075_v17 = vpop.eup %2074 }
 0x467   : > { %v1198_v18 = vsel %vm792_vm3, %v2075_v17, 0.0 }
 0x468   : > { %1199 = vadd.xlane.f32.xlu0 %v1198_v18 }
 0x470   : > { %v848_v19 = vpop.xlane.xlu0 %847 }
 0x471   : > { %2076 = vrcp.f32 %v848_v19  ;;  %v2066_v19 = vld [vmem:[#allocation20 + $0x10] sm:$0xff]  }
 0x47b   : > { %v2077_v20 = vpop.eup %2076 }
 0x47c   : > { %v850_v21 = vmul.f32 %v2077_v20, %v2069_v60  ;;  %v2067_v20 = vld [vmem:[#allocation20 + $0x18] sm:$0xff]  }
 0x47e   : > { %1087 = vrot.lane.b32.xlu0 %v1723_v9, %s2579_s28  ;;  %v851_v22 = vpack.c.bf16 %v850_v21, %v850_v21  ;;  %v2065_v9 = vld [vmem:[#allocation20 + $0x8] sm:$0xff]   ;;  %v1731_v21 = vld [vmem:[#allocation19] ss:$0 sm:$0xff] }
 0x480   : > { %1803 = vmatmul.mubr.msk.bf16.vlgmr.msra.gmra.mrb[4].mxu1 %vm792_vm3, %v851_v22 }
 0x481   : > { %1814 = vmatprep.mubr.msk.bf16.mxu1 %vm2578_vm0, %v2577_v0 }
 0x4c8   : > { %v971_v23 = vpop.permute.xlu1 %970 }
 0x4c9   : > { %v976_v24 = vsel %vm855_vm4, %v971_v23, 0 }
 0x4ca   : > { %1813 = vmatpush3.bf16.msra.mxu1 %v976_v24 }
 0x4cb   : > { %1824 = vmatprep.subr.bf16.mxu1 %v2577_v0 }
 0x4cc   : > { %v1205_v35 = vpop.permute.xlu1 %1204 }
 0x4cd   : > { %v1210_v37 = vsel %vm855_vm4, %v1205_v35, 0 }
 0x4e5   : > { %v963_v25 = vpop.xlane.xlu0 %962 }
 0x4e6   : > { %2078 = vrcp.f32 %v963_v25 }
 0x4ed   : > { %v1083_v26 = vpop.xlane.xlu0 %1082 }
 0x4ee   : > { %2080 = vrcp.f32 %v1083_v26 }
 0x4f0   : > { %v2079_v27 = vpop.eup %2078 }
 0x4f1   : > { %v965_v28 = vmul.f32 %v2079_v27, %v2071_v10 }
 0x4f3   : > { %v966_v29 = vpack.c.bf16 %v965_v28, %v965_v28 }
 0x4f5   : > { %1815 = vmatmul.mubr.msk.bf16.vlgmr.msra.gmra.mrb[8].mxu1 %vm792_vm3, %v966_v29  ;;  %v1200_v30 = vpop.xlane.xlu0 %1199  ;;  %v1735_v29 = vld [vmem:[#allocation22] ss:$0 sm:$0xff] }
 0x4f6   : > { %2082 = vrcp.f32 %v1200_v30  ;;  %1826 = vmatprep.mubr.msk.bf16.mxu1 %vm2578_vm0, %v2577_v0 }
 0x4f8   : > { %v2081_v31 = vpop.eup %2080 }
 0x4f9   : > { %v1085_v32 = vmul.f32 %v2081_v31, %v2073_v15  ;;  %v1088_v33 = vpop.permute.xlu0 %1087  ;;  %v1730_v15 = vld [vmem:[#allocation16] ss:$0 sm:$0xff] }
 0x4fa   : > { %v1093_v34 = vsel %vm855_vm4, %v1088_v33, 0 }
 0x4fb   : > { %1825 = vmatpush3.bf16.msra.mxu1 %v1093_v34  ;;  %v1086_v36 = vpack.c.bf16 %v1085_v32, %v1085_v32 }
 0x4fc   : > { %1836 = vmatprep.subr.bf16.mxu1 %v2577_v0 }
 0x4fe   : > { %1827 = vmatmul.mubr.msk.bf16.vlgmr.msra.gmra.mrb[12].mxu1 %vm792_vm3, %v1086_v36 }
 0x4ff   : > { %1837 = vmatpush3.bf16.msra.mxu1 %v1210_v37  ;;  %1838 = vmatprep.mubr.msk.bf16.mxu1 %vm2578_vm0, %v2577_v0 }
 0x500   : > { %v2083_v38 = vpop.eup %2082  ;;  %1850 = vmatprep.subr.bf16.mxu1 %v2577_v0 }
 0x501   : > { %v1202_v39 = vmul.f32 %v2083_v38, %v2075_v17 }
 0x503   : > { %v1203_v40 = vpack.c.bf16 %v1202_v39, %v1202_v39 }
 0x506   : > { %1839 = vmatmul.mubr.msk.bf16.vlgmr.msra.gmra.mrb[16].mxu1 %vm792_vm3, %v1203_v40 }
 0x507   : > { %1858 = vmatprep.mubr.msk.bf16.mxu1 %vm2578_vm0, %v2577_v0  ;;  %1851 = vmatpush3.bf16.msra.mxu1 %v2064_v8 }
 0x508   : > { %1852 = vmatprep.subr.bf16.mxu1 %v2577_v0 }
 0x50b   : > { %1853 = vmatpush3.bf16.msra.mxu1 %v2065_v9 }
 0x50c   : > { %1854 = vmatprep.subr.bf16.mxu1 %v2577_v0 }
 0x50f   : > { %1855 = vmatpush3.bf16.msra.mxu1 %v2066_v19 }
 0x510   : > { %1856 = vmatprep.subr.bf16.mxu1 %v2577_v0 }
 0x513   : > { %1857 = vmatpush3.bf16.msra.mxu1 %v2067_v20 }
 0x553   : > { %v893_v41 = vpop.f32.mrb[4].mxu1 }
 0x554   : > { %899 = vst.msk [vmem:[#allocation4] sm:$0xff] %vm792_vm3, %v893_v41  ;;  %v1804_v42 = vpop.f32.mrb[5].mxu1 }
 0x555   : > { %v896_v43 = vpop.f32.mrb[6].mxu1 }
 0x556   : > { %v1805_v44 = vpop.f32.mrb[7].mxu1 }
 0x5c8   : > { %v1012_v45 = vpop.f32.mrb[8].mxu1 }
 0x5c9   : > { %1019 = vrot.lane.b32.xlu1 %v1012_v45, %s2583_s18  ;;  %v1816_v46 = vpop.f32.mrb[9].mxu1  ;;  %v1741_v45 = vld [vmem:[#allocation23] ss:$0 sm:$0xff]  ;;  %s1468_s18 = scalar_lea.sflag [#allocation7], %s3039_s15 }
 0x5ca   : > { %v1015_v47 = vpop.f32.mrb[10].mxu1 }
 0x5cb   : > { %v1817_v48 = vpop.f32.mrb[11].mxu1  ;;  %v1742_v47 = vld [vmem:[#allocation25] ss:$0 sm:$0xff] }
 0x5d1   : > { %v1129_v49 = vpop.f32.mrb[12].mxu1 }
 0x5d2   : > { %1136 = vrot.lane.b32.xlu1 %v1129_v49, %s2584_s21  ;;  %v1828_v50 = vpop.f32.mrb[13].mxu1  ;;  %s2454_s21 = scalar_lea.vmem %s3175_s1, 128 }
 0x5d3   : > { %v1132_v51 = vpop.f32.mrb[14].mxu1  ;;  %p2455_p2 = scmp.ne.s32.totalorder %s3175_s1, %s2454_s21 }
 0x5d4   : > { %v1829_v52 = vpop.f32.mrb[15].mxu1 }
 0x5d5   : > { %p2456_p10 = pnand %p2455_p2, %p3284_p9 }
 0x5d7   : > { %p2457_p1 = pneg %p2456_p10 }
 0x5d9   : > { %v1246_v53 = vpop.f32.mrb[16].mxu1 }
 0x5da   : > { %1253 = vrot.lane.b32.xlu1 %v1246_v53, %s2585_s2  ;;  %v1840_v54 = vpop.f32.mrb[17].mxu1  ;;  %s2458_s2 = sshll.u32 %s2586_s0, 4  ;;  %s2459_s2 = int_to_ptr.vmem [resolvable:$false] %s2458_s2 }
 0x5db   : > { %v1249_v55 = vpop.f32.mrb[18].mxu1  ;;  %s2460_s24 = scalar_lea.vmem %s2459_s2, 256  ;;  %p2461_p0 = scmp.lt.s32.totalorder %s3175_s1, %s2459_s2 }
 0x5dc   : > { %v1841_v56 = vpop.f32.mrb[19].mxu1  ;;  %p2462_p7 = scmp.lt.s32.totalorder %s2460_s24, %s2454_s21 }
 0x5de   : > { %p2463_p5 = por %p2462_p7, %p2461_p0 }
 0x5e0   : > { %p2464_p8 = pnand %p2463_p5, %p2457_p1 }
 0x63b   : > { %v1020_v57 = vpop.permute.xlu1 %1019 }
 0x63c   : > { %1023 = vst.msk [vmem:[#allocation4] sm:$0xff] %vm1022_vm5, %v1020_v57 }
 0x644   : > { %v1137_v58 = vpop.permute.xlu1 %1136 }
 0x645   : > { %1140 = vst.msk [vmem:[#allocation4] sm:$0xff] %vm1139_vm6, %v1137_v58 }
 0x64c   : > { %v1254_v59 = vpop.permute.xlu1 %1253 }
 0x64d   : > { %1257 = vst.msk [vmem:[#allocation4] sm:$0xff] %vm1256_vm7, %v1254_v59 }
 0x654   : > { %v1258_v60 = vld [vmem:[#allocation4] sm:$0xff] }
 0x655   : > { %v1259_v61 = vadd.f32 %v1258_v60, %v3079_v3 }
 0x657   : > { %v1260_v62 = vsel %vm658_vm1, %v1259_v61, 0.0 }
 0x658   : > { %1261 = vadd.xlane.f32.xlu1 %v1260_v62 }
 0x6e5   : > { %v1262_v63 = vpop.xlane.xlu1 %1261 }
 0x6e6   : > { %v1264_v1 = vmul.f32 0.03125, %v1262_v63 }
 0x6e8   : > { %v1265_v2 = vsub.f32 %v1259_v61, %v1264_v1 }
 0x6ea   : > { %v1266_v4 = vmul.f32 %v1265_v2, %v1265_v2 }
 0x6ec   : > { %v1267_v5 = vsel %vm658_vm1, %v1266_v4, 0.0 }
 0x6ed   : > { %1268 = vadd.xlane.f32.xlu0 %v1267_v5 }
 0x77a   : > { %v1269_v3 = vpop.xlane.xlu0 %1268 }
 0x77b   : > { %v1270_v10 = vmul.f32 0.03125, %v1269_v3 }
 0x77d   : > { %v1271_v11 = vadd.f32 1e-05, %v1270_v10 }
 0x77f   : > { %2084 = vrsqrt.f32 %v1271_v11 }
 0x789   : > { %v2085_v12 = vpop.eup %2084 }
 0x78a   : > { %v1273_v14 = vmul.f32 %v2085_v12, %v1265_v2 }
 0x78c   : > { %v1280_v16 = vmul.f32 %v1729_v13, %v1273_v14 }
 0x78e   : > { %v1287_v17 = vadd.f32 %v1730_v15, %v1280_v16 }
 0x790   : > { %v1288_v18 = vpack.c.bf16 %v1287_v17, %v1287_v17 }
 0x792   : > { %1847 = vmatmul.mubr.msk.bf16.vlgmr.msra.gmra.mrb[20].mxu0 %vm658_vm1, %v1288_v18 }
 0x865   : > { %v1348_v22 = vpop.f32.mrb[20].mxu0 }
 0x866   : > { %v1349_v23 = vadd.f32 %v1731_v21, %v1348_v22  ;;  %v1848_v24 = vpop.f32.mrb[21].mxu0 }
 0x867   : > { %v1351_v25 = vpop.f32.mrb[22].mxu0 }
 0x868   : > { %v1354_v26 = vmax.f32 %v1349_v23, 0.0  ;;  %v1849_v27 = vpop.f32.mrb[23].mxu0 }
 0x86a   : > { %v1355_v28 = vpack.c.bf16 %v1354_v26, %v1354_v26 }
 0x86c   : > { %1859 = vmatmul.mubr.msk.bf16.vlgmr.msra.gmra.mrb[20].mxu1 %vm1394_vm8, %v1355_v28 }
 0x93f   : > { %v1432_v30 = vpop.f32.mrb[20].mxu1 }
 0x940   : > { %v1433_v31 = vadd.f32 %v1735_v29, %v1432_v30  ;;  %v1860_v32 = vpop.f32.mrb[21].mxu1 }
 0x941   : > { %v1435_v33 = vpop.f32.mrb[22].mxu1 }
 0x942   : > { %v1861_v34 = vpop.f32.mrb[23].mxu1  ;;  %v1438_v35 = vadd.f32 %v1433_v31, %v1287_v17 }
 0x944   : > { %v1439_v0 = vsel %vm658_vm1, %v1438_v35, 0.0 }
 0x945   : > { %1440 = vadd.xlane.f32.xlu0 %v1439_v0 }
 0x9d2   : > { %v1441_v36 = vpop.xlane.xlu0 %1440 }
 0x9d3   : > { %v1442_v37 = vmul.f32 0.03125, %v1441_v36 }
 0x9d5   : > { %v1443_v38 = vsub.f32 %v1438_v35, %v1442_v37 }
 0x9d7   : > { %v1444_v39 = vmul.f32 %v1443_v38, %v1443_v38 }
 0x9d9   : > { %v1445_v40 = vsel %vm658_vm1, %v1444_v39, 0.0 }
 0x9da   : > { %1446 = vadd.xlane.f32.xlu1 %v1445_v40 }
 0xa67   : > { %v1447_v41 = vpop.xlane.xlu1 %1446 }
 0xa68   : > { %v1448_v42 = vmul.f32 0.03125, %v1447_v41 }
 0xa6a   : > { %v1449_v43 = vadd.f32 1e-05, %v1448_v42 }
 0xa6c   : > { %2086 = vrsqrt.f32 %v1449_v43 }
 0xa76   : > { %v2087_v44 = vpop.eup %2086 }
 0xa77   : > { %v1451_v46 = vmul.f32 %v2087_v44, %v1443_v38 }
 0xa79   : > { %v1458_v48 = vmul.f32 %v1741_v45, %v1451_v46 }
 0xa7b   : > { %v1465_v49 = vadd.f32 %v1742_v47, %v1458_v48 }
 0xa7d   : > { %1466 = vst.msk [vmem:[%s627_s25] sm:$0xff] %vm658_vm1, %v1465_v49 }
 0xa7e   : > { %2467 = shalt.err (!%p2464_p8)
}
 0xa7f   : > { %s2468_s15 = scalar_lea.hbm %s3173_s14, 128  ;;  %s2472_s28 = scalar_lea.hbm %s3283_s23, 256 }
 0xa80   : > { %p2469_p3 = scmp.ne.s32.totalorder %s3173_s14, %s2468_s15  ;;  %p2473_p13 = scmp.lt.u32.totalorder %s3173_s14, %s3283_s23 }
 0xa81   : > { %p2474_p12 = scmp.lt.u32.totalorder %s2472_s28, %s2468_s15  ;;  %p2476_p2 = scmp.lt.u32.totalorder %s2468_s15, %s3173_s14 }
 0xa82   : > { %p2470_p11 = pnand %p2469_p3, %p3284_p9 }
 0xa83   : > { %p2475_p4 = por %p2474_p12, %p2473_p13 }
 0xa84   : > { %p2471_p6 = pneg %p2470_p11 }
 0xa85   : > { %p2477_p10 = por %p2476_p2, %p2475_p4 }
 0xa87   : > { %p2478_p1 = pnand %p2477_p10, %p2471_p6 }
 0xa89   : > { %2481 = shalt.err (!%p2478_p1)
}
 0xa8a   : > { %1912 = dma.vmem_to_hbm [thread:$0]  (%p3284_p9), %s3175_s1, 128, %s3173_s14, %s1468_s18  }
 0xa8b PF: > { %s3285_s21 = sld [smem:[#allocation35_spill]]  ;;  %p3286_p0 = scmp.ne.s32.totalorder %s3274_s13, 0 }
 0xa8c   : > { %p3287_p7 = scmp.ge.s32.totalorder %s2560_s30, 2 }
 0xa8e   : > { %p1956_p5 = pnand %p3287_p7, %p3286_p0 }
 0xa91   : > { %s1494_s2 = sand.u32 1, %s3285_s21  }
 0xa92   : > { %s1495_s24 = scalar_lea.sflag [#allocation7], %s1494_s2 }
 0xa93   : > { %2535 = dma.done.wait (!%p1956_p5), %s1495_s24, 128  }
 0xa94   : > { %2537 = vsyncadd (!%p1956_p5), %s1495_s24, 4294967168  ;;  %s35_s30 = sadd.s32 1, %s2560_s30   ;;  %s3288_s25 = sld [smem:[#allocation36_spill]] }
 0xa95   : > { %p32_p8 = scmp.ge.s32.totalorder %s35_s30, 4   ;;  %s3289_s26 = smov %s2548_s27 }
 0xa96   : > { %s3290_s27 = smov %s2989_s20  ;;  %s3291_s28 = smov %s2556_s29 }
 0xa97   : > { %s3292_s29 = smov %s3294_s22  ;;  %34 = sbr.rel (!%p32_p8) target bundleno = 17 (0x11), region = 170 }
 0xa9e   :  { %1500 = vsyncpa [#allocation6], 1 }
 0xa9f   :  { %1502 = vsyncpa [#allocation6 + $0x1], 1 }
 0xaa0   :  { %1503 = vsyncpa [#allocation9], 1 }
 0xaa1   :  { %1504 = vsyncpa [#allocation12], 1 }
 0xaa2   :  { %1505 = vsyncpa [#allocation15], 1 }
 0xaa3   :  { %1506 = vsyncpa [#allocation18], 1 }
 0xaa4   :  { %1507 = vsyncpa [#allocation21], 1 }
 0xaa5   :  { %1508 = vsyncpa [#allocation24], 1 }
 0xaa6   :  { %1509 = vsyncpa [#allocation7], 1 }
 0xaa7   :  { %1511 = vsyncpa [#allocation7 + $0x1], 1 }

</bundles_post_ra>
